<compile_context>
chip_gen: v7x
topology: tpu7x:2x2x1
jax: 0.10.0
libtpu: 0.0.40
codegen_flags: <defaults>
</compile_context>

<pallas_src>
import functools

import jax
import jax.numpy as jnp
from jax.experimental import pallas as pl
from jax.experimental.pallas import tpu as pltpu


# --------------------------------------------------------------------------- helpers


def _round_up(x, m):
    return ((x + m - 1) // m) * m


def _vmem_capacity_bytes():
    try:
        return int(pltpu.get_tpu_info().vmem_capacity_bytes)
    except Exception:
        return 64 << 20  # v7x per-TensorCore size = smallest across generations


def _supports_bf16_elementwise():
    """v6e/v7x have a bf16 VALU/EUP; v5e and earlier do not."""
    try:
        kind = jax.devices()[0].device_kind.lower()
    except Exception:
        return True
    return not any(tag in kind for tag in ("v2", "v3", "v4", "v5"))


def _auto_tb(batch, d_in, d_out, act_itemsize, target_tb=2048):
    """Batch tile: as large as VMEM allows (target 2048 rows), and >=2 grid steps
    whenever the batch allows it so both v7x TensorCores get work."""
    budget = _vmem_capacity_bytes() // 2          # headroom for weights / scratch
    per_row = (4 * (2 * d_in + 2 * d_out)         # double-buffered x / out tiles (f32)
               + 8 * 128 * act_itemsize           # live 128-wide activations
               + 4 * 128)                         # slack for f32 temporaries
    tb_cap = max(128, (budget // per_row) // 128 * 128)
    tb = min(target_tb, tb_cap)
    if batch <= 128:
        return _round_up(max(batch, 8), 8)        # one (sublane-padded) tile
    half = _round_up(-(-batch // 2), 128)         # ceil(batch/2) rounded up to 128
    return max(128, min(tb, half))


def _pack_params(params, use_bf16):
    """Zero-pad hidden widths to 128 (exact math) and pack into constant slabs."""
    (w1, b1), (w2, b2), (w3, b3), (w4, b4), (w5, b5), (w6, b6) = params

    def pad2(a, rows, cols):
        out = jnp.zeros((rows, cols), a.dtype)
        return out.at[: a.shape[0], : a.shape[1]].set(a)

    w_mid = jnp.stack([pad2(w2, 128, 128), pad2(w3, 128, 128),
                       pad2(w4, 128, 128), pad2(w5, 128, 128)])     # (4,128,128)
    b_mid = jnp.concatenate([pad2(b1, 1, 128), pad2(b2, 1, 128),
                             pad2(b3, 1, 128), pad2(b4, 1, 128),
                             pad2(b5, 1, 128)], axis=0)             # (5,128) f32
    w_first, w_last, b_last = w1, w6, b6
    if use_bf16:
        w_first = w_first.astype(jnp.bfloat16)
        w_mid = w_mid.astype(jnp.bfloat16)
        w_last = w_last.astype(jnp.bfloat16)
    return w_first, w_mid, w_last, b_mid, b_last


# --------------------------------------------------------------------------- kernel


def _ae3_kernel(x_ref, w1_ref, wmid_ref, w6_ref, bmid_ref, b6_ref, o_ref,
                *, act_dtype):
    b_all = bmid_ref[...]                                  # (5,128) f32 biases

    def layer(h, w, b):
        # MXU matmul with f32 accumulation; bias add + ReLU in f32 on the VPU;
        # keep the inter-layer activation in act_dtype (bf16 on v6e/v7x).
        y = jnp.dot(h.astype(w.dtype), w, preferred_element_type=jnp.float32) + b
        return jnp.maximum(y, 0.0).astype(act_dtype)

    h = x_ref[...]
    h = layer(h, w1_ref[...], b_all[0:1])                  # D_in -> 128
    h = layer(h, wmid_ref[0], b_all[1:2])                  # 128 -> 64  (padded to 128)
    h = layer(h, wmid_ref[1], b_all[2:3])                  # 64  -> 32  (padded)
    h = layer(h, wmid_ref[2], b_all[3:4])                  # 32  -> 64  (padded)
    h = layer(h, wmid_ref[3], b_all[4:5])                  # 64  -> 128 (padded)
    y = jnp.dot(h.astype(w6_ref.dtype), w6_ref[...],
                preferred_element_type=jnp.float32) + b6_ref[...]
    # Only the real D_out columns exist here -> sigmoid runs only on real outputs
    # and the store writes exactly D_out f32 columns per row.
    o_ref[...] = jax.nn.sigmoid(y).astype(o_ref.dtype)


# --------------------------------------------------------------------------- wrapper


@functools.partial(jax.jit, static_argnames=("tb", "use_bf16", "bf16_act"))
def _ae3_impl(x, params, tb, use_bf16, bf16_act):
    B, D_in = x.shape
    D_out = params[-1][0].shape[1]

    consts = _pack_params(params, use_bf16)                # (w1, w_mid, w6, b_mid, b6)
    act_dtype = jnp.bfloat16 if (use_bf16 and bf16_act) else jnp.float32

    def const_spec(a):
        nd = a.ndim
        return pl.BlockSpec(a.shape, lambda i, _nd=nd: (0,) * _nd)

    in_specs = ([pl.BlockSpec((tb, D_in), lambda i: (i, 0))]
                + [const_spec(a) for a in consts])
    out_specs = pl.BlockSpec((tb, D_out), lambda i: (i, 0))

    # VMEM budget: constant slabs (double-buffered but tiny) + x/out tiles +
    # live activations, 50% slack, capped at ~70% of physical VMEM.
    w_bytes = sum(int(a.size) * a.dtype.itemsize for a in consts)
    io_bytes = 2 * tb * D_in * 4 + 2 * tb * D_out * 4
    act_bytes = 8 * tb * 128 * 4
    needed = 2 * w_bytes + io_bytes + act_bytes
    cap = max(int(0.7 * _vmem_capacity_bytes()), 16 << 20)
    vmem_limit = int(min(max(int(1.5 * needed), 16 << 20), cap))

    flops = 2 * B * (D_in * 128 + 4 * 128 * 128 + 128 * D_out)
    cost = pl.CostEstimate(flops=flops,
                           transcendentals=B * D_out,
                           bytes_accessed=4 * B * (D_in + D_out) + w_bytes)

    kernel = functools.partial(_ae3_kernel, act_dtype=act_dtype)

    return pl.pallas_call(
        kernel,
        out_shape=jax.ShapeDtypeStruct((B, D_out), jnp.float32),
        grid=(pl.cdiv(B, tb),),          # partial last block: rows are independent
        in_specs=in_specs,
        out_specs=out_specs,
        compiler_params=pltpu.CompilerParams(
            dimension_semantics=("parallel",),
            vmem_limit_bytes=vmem_limit,
        ),
        cost_estimate=cost,
    )(x, *consts)


def ae3_forward(x, params, tb=None, use_bf16=True):
    """params = [(w1,b1), ..., (w6,b6)] with w: (in, out), b: (1, out).

    Returns (y, None) to match the PyTorch forward signature.
    Note: use_bf16=True feeds the MXU with bf16 weights/activations (f32
    accumulate); it differs from f32 PyTorch numerics at the ~1e-2 level.
    Pass use_bf16=False for bit-closer parity.
    """
    B, D_in = x.shape
    D_out = params[-1][0].shape[1]
    bf16_act = bool(use_bf16) and _supports_bf16_elementwise()
    act_itemsize = 2 if bf16_act else 4
    if tb is None:
        tb = _auto_tb(B, D_in, D_out, act_itemsize)
    y = _ae3_impl(x, params, int(tb), bool(use_bf16), bf16_act)
    return y, None


# --------------------------------------------------------------------------- test


def make_params(key, d_in, d_out):
    """Deterministic synthetic parameters (shapes match the nn.Linear layers)."""
    dims = [(d_in, 128), (128, 64), (64, 32), (32, 64), (64, 128), (128, d_out)]
    params = []
    for fan_in, fan_out in dims:
        key, kw, kb = jax.random.split(key, 3)
        bound = 1.0 / (fan_in ** 0.5)
        w = jax.random.uniform(kw, (fan_in, fan_out), jnp.float32, -bound, bound)
        b = jax.random.uniform(kb, (1, fan_out), jnp.float32, -bound, bound)
        params.append((w, b))
    return params


def ae3_reference(x, params):
    h = x
    for i, (w, b) in enumerate(params):
        h = h @ w + b
        h = jax.nn.sigmoid(h) if i == len(params) - 1 else jnp.maximum(h, 0.0)
    return h


if __name__ == "__main__":
    # Small shapes; B=200 with tb=128 exercises the multi-step grid and the
    # partial (masked) last block.
    B, D_in, D_out = 200, 16, 16
    key = jax.random.PRNGKey(0)
    kx, kp = jax.random.split(key)
    x = jax.random.uniform(kx, (B, D_in), jnp.float32)
    params = make_params(kp, D_in, D_out)

    y_ref = ae3_reference(x, params)

    # f32 MXU path: near-exact, tight tolerance.
    y32, aux = ae3_forward(x, params, tb=128, use_bf16=False)
    y32 = jax.block_until_ready(y32)
    assert aux is None
    assert y32.shape == (B, D_out)
    assert jnp.allclose(y32, y_ref, atol=1e-4, rtol=1e-4), "f32 mismatch vs reference"

    # Default configuration: bf16 MXU inputs, auto batch tile.
    y16, _ = ae3_forward(x, params)
    y16 = jax.block_until_ready(y16)
    assert y16.shape == (B, D_out)
    assert jnp.allclose(y16, y_ref, atol=3e-2, rtol=3e-2), "bf16 mismatch vs reference"

    print("KERNEL_OK")
</pallas_src>

<mosaic_0001>
module attributes {stable_mosaic.version = 11 : i64} {
  func.func @_ae3_kernel(%arg0: i32, %arg1: memref<128x16xf32, #tpu.memory_space<vmem>>, %arg2: memref<16x128xf32, #tpu.memory_space<vmem>>, %arg3: memref<4x128x128xf32, #tpu.memory_space<vmem>>, %arg4: memref<128x16xf32, #tpu.memory_space<vmem>>, %arg5: memref<5x128xf32, #tpu.memory_space<vmem>>, %arg6: memref<1x16xf32, #tpu.memory_space<vmem>>, %arg7: memref<128x16xf32, #tpu.memory_space<vmem>>) attributes {dimension_semantics = [#tpu.dimension_semantics<parallel>], iteration_bounds = array<i64: 2>, scalar_prefetch = 0 : i64, scratch_operands = 0 : i64, tpu.core_type = #tpu.core_type<tc>, window_params = [{transform_indices = @transform_0, window_bounds = array<i64: 128, 16>}, {pipeline_mode = #tpu.pipeline_mode<synchronous>, transform_indices = @transform_1, window_bounds = array<i64: 16, 128>}, {pipeline_mode = #tpu.pipeline_mode<synchronous>, transform_indices = @transform_2, window_bounds = array<i64: 4, 128, 128>}, {pipeline_mode = #tpu.pipeline_mode<synchronous>, transform_indices = @transform_3, window_bounds = array<i64: 128, 16>}, {pipeline_mode = #tpu.pipeline_mode<synchronous>, transform_indices = @transform_4, window_bounds = array<i64: 5, 128>}, {pipeline_mode = #tpu.pipeline_mode<synchronous>, transform_indices = @transform_5, window_bounds = array<i64: 1, 16>}, {transform_indices = @transform_6, window_bounds = array<i64: 128, 16>}]} {
    %c0 = arith.constant 0 : index
    %c0_0 = arith.constant 0 : index
    %0 = vector.load %arg5[%c0, %c0_0] : memref<5x128xf32, #tpu.memory_space<vmem>>, vector<5x128xf32>
    %c0_1 = arith.constant 0 : index
    %c0_2 = arith.constant 0 : index
    %1 = vector.load %arg1[%c0_1, %c0_2] : memref<128x16xf32, #tpu.memory_space<vmem>>, vector<128x16xf32>
    %c0_3 = arith.constant 0 : index
    %c0_4 = arith.constant 0 : index
    %2 = vector.load %arg2[%c0_3, %c0_4] : memref<16x128xf32, #tpu.memory_space<vmem>>, vector<16x128xf32>
    %3 = vector.extract_strided_slice %0 {offsets = [0, 0], sizes = [1, 128], strides = [1, 1]} : vector<5x128xf32> to vector<1x128xf32>
    %cst = arith.constant dense<0.000000e+00> : vector<128x128xf32>
    %4 = tpu.matmul %1, %2, %cst {dimension_numbers = #tpu.dot_dimension_numbers<[1], [0], [0], [1], [0, 0, 1, 1], [], []>} : vector<128x16xf32>, vector<16x128xf32>, vector<128x128xf32> -> vector<128x128xf32>
    %5 = vector.broadcast %3 : vector<1x128xf32> to vector<128x128xf32>
    %6 = arith.addf %4, %5 : vector<128x128xf32>
    %cst_5 = arith.constant 0.000000e+00 : f32
    %7 = vector.broadcast %cst_5 : f32 to vector<128x128xf32>
    %8 = arith.maximumf %6, %7 : vector<128x128xf32>
    %c0_6 = arith.constant 0 : index
    %c0_7 = arith.constant 0 : index
    %c0_8 = arith.constant 0 : index
    %9 = vector.load %arg3[%c0_6, %c0_7, %c0_8] : memref<4x128x128xf32, #tpu.memory_space<vmem>>, vector<1x128x128xf32>
    %10 = vector.shape_cast %9 : vector<1x128x128xf32> to vector<128x128xf32>
    %11 = vector.extract_strided_slice %0 {offsets = [1, 0], sizes = [1, 128], strides = [1, 1]} : vector<5x128xf32> to vector<1x128xf32>
    %cst_9 = arith.constant dense<0.000000e+00> : vector<128x128xf32>
    %12 = tpu.matmul %8, %10, %cst_9 {dimension_numbers = #tpu.dot_dimension_numbers<[1], [0], [0], [1], [0, 0, 1, 1], [], []>} : vector<128x128xf32>, vector<128x128xf32>, vector<128x128xf32> -> vector<128x128xf32>
    %13 = vector.broadcast %11 : vector<1x128xf32> to vector<128x128xf32>
    %14 = arith.addf %12, %13 : vector<128x128xf32>
    %cst_10 = arith.constant 0.000000e+00 : f32
    %15 = vector.broadcast %cst_10 : f32 to vector<128x128xf32>
    %16 = arith.maximumf %14, %15 : vector<128x128xf32>
    %c1 = arith.constant 1 : index
    %c0_11 = arith.constant 0 : index
    %c0_12 = arith.constant 0 : index
    %17 = vector.load %arg3[%c1, %c0_11, %c0_12] : memref<4x128x128xf32, #tpu.memory_space<vmem>>, vector<1x128x128xf32>
    %18 = vector.shape_cast %17 : vector<1x128x128xf32> to vector<128x128xf32>
    %19 = vector.extract_strided_slice %0 {offsets = [2, 0], sizes = [1, 128], strides = [1, 1]} : vector<5x128xf32> to vector<1x128xf32>
    %cst_13 = arith.constant dense<0.000000e+00> : vector<128x128xf32>
    %20 = tpu.matmul %16, %18, %cst_13 {dimension_numbers = #tpu.dot_dimension_numbers<[1], [0], [0], [1], [0, 0, 1, 1], [], []>} : vector<128x128xf32>, vector<128x128xf32>, vector<128x128xf32> -> vector<128x128xf32>
    %21 = vector.broadcast %19 : vector<1x128xf32> to vector<128x128xf32>
    %22 = arith.addf %20, %21 : vector<128x128xf32>
    %cst_14 = arith.constant 0.000000e+00 : f32
    %23 = vector.broadcast %cst_14 : f32 to vector<128x128xf32>
    %24 = arith.maximumf %22, %23 : vector<128x128xf32>
    %c2 = arith.constant 2 : index
    %c0_15 = arith.constant 0 : index
    %c0_16 = arith.constant 0 : index
    %25 = vector.load %arg3[%c2, %c0_15, %c0_16] : memref<4x128x128xf32, #tpu.memory_space<vmem>>, vector<1x128x128xf32>
    %26 = vector.shape_cast %25 : vector<1x128x128xf32> to vector<128x128xf32>
    %27 = vector.extract_strided_slice %0 {offsets = [3, 0], sizes = [1, 128], strides = [1, 1]} : vector<5x128xf32> to vector<1x128xf32>
    %cst_17 = arith.constant dense<0.000000e+00> : vector<128x128xf32>
    %28 = tpu.matmul %24, %26, %cst_17 {dimension_numbers = #tpu.dot_dimension_numbers<[1], [0], [0], [1], [0, 0, 1, 1], [], []>} : vector<128x128xf32>, vector<128x128xf32>, vector<128x128xf32> -> vector<128x128xf32>
    %29 = vector.broadcast %27 : vector<1x128xf32> to vector<128x128xf32>
    %30 = arith.addf %28, %29 : vector<128x128xf32>
    %cst_18 = arith.constant 0.000000e+00 : f32
    %31 = vector.broadcast %cst_18 : f32 to vector<128x128xf32>
    %32 = arith.maximumf %30, %31 : vector<128x128xf32>
    %c3 = arith.constant 3 : index
    %c0_19 = arith.constant 0 : index
    %c0_20 = arith.constant 0 : index
    %33 = vector.load %arg3[%c3, %c0_19, %c0_20] : memref<4x128x128xf32, #tpu.memory_space<vmem>>, vector<1x128x128xf32>
    %34 = vector.shape_cast %33 : vector<1x128x128xf32> to vector<128x128xf32>
    %35 = vector.extract_strided_slice %0 {offsets = [4, 0], sizes = [1, 128], strides = [1, 1]} : vector<5x128xf32> to vector<1x128xf32>
    %cst_21 = arith.constant dense<0.000000e+00> : vector<128x128xf32>
    %36 = tpu.matmul %32, %34, %cst_21 {dimension_numbers = #tpu.dot_dimension_numbers<[1], [0], [0], [1], [0, 0, 1, 1], [], []>} : vector<128x128xf32>, vector<128x128xf32>, vector<128x128xf32> -> vector<128x128xf32>
    %37 = vector.broadcast %35 : vector<1x128xf32> to vector<128x128xf32>
    %38 = arith.addf %36, %37 : vector<128x128xf32>
    %cst_22 = arith.constant 0.000000e+00 : f32
    %39 = vector.broadcast %cst_22 : f32 to vector<128x128xf32>
    %40 = arith.maximumf %38, %39 : vector<128x128xf32>
    %c0_23 = arith.constant 0 : index
    %c0_24 = arith.constant 0 : index
    %41 = vector.load %arg4[%c0_23, %c0_24] : memref<128x16xf32, #tpu.memory_space<vmem>>, vector<128x16xf32>
    %cst_25 = arith.constant dense<0.000000e+00> : vector<128x16xf32>
    %42 = tpu.matmul %40, %41, %cst_25 {dimension_numbers = #tpu.dot_dimension_numbers<[1], [0], [0], [1], [0, 0, 1, 1], [], []>} : vector<128x128xf32>, vector<128x16xf32>, vector<128x16xf32> -> vector<128x16xf32>
    %c0_26 = arith.constant 0 : index
    %c0_27 = arith.constant 0 : index
    %43 = vector.load %arg6[%c0_26, %c0_27] : memref<1x16xf32, #tpu.memory_space<vmem>>, vector<1x16xf32>
    %44 = vector.broadcast %43 : vector<1x16xf32> to vector<128x16xf32>
    %45 = arith.addf %42, %44 : vector<128x16xf32>
    %46 = arith.negf %45 : vector<128x16xf32>
    %47 = math.exp %46 : vector<128x16xf32>
    %cst_28 = arith.constant 1.000000e+00 : f32
    %48 = vector.broadcast %cst_28 : f32 to vector<128x16xf32>
    %49 = arith.addf %48, %47 : vector<128x16xf32>
    %50 = arith.divf %48, %49 : vector<128x16xf32>
    %c0_29 = arith.constant 0 : index
    %c0_30 = arith.constant 0 : index
    %51 = vector.load %arg7[%c0_29, %c0_30] : memref<128x16xf32, #tpu.memory_space<vmem>>, vector<128x16xf32>
    tpu.vector_store %arg7[%c0_29, %c0_30], %50 {strides = array<i32>} : memref<128x16xf32, #tpu.memory_space<vmem>>, vector<128x16xf32>,
    return
  }
  func.func @transform_0(%arg0: i32) -> (i32, i32) {
    %c0_i32 = arith.constant 0 : i32
    %c0_i32_0 = arith.constant 0 : i32
    return %arg0, %c0_i32 : i32, i32
  }
  func.func @transform_1(%arg0: i32) -> (i32, i32) {
    %c0_i32 = arith.constant 0 : i32
    %c0_i32_0 = arith.constant 0 : i32
    %c0_i32_1 = arith.constant 0 : i32
    return %c0_i32, %c0_i32_0 : i32, i32
  }
  func.func @transform_2(%arg0: i32) -> (i32, i32, i32) {
    %c0_i32 = arith.constant 0 : i32
    %c0_i32_0 = arith.constant 0 : i32
    %c0_i32_1 = arith.constant 0 : i32
    %c0_i32_2 = arith.constant 0 : i32
    return %c0_i32, %c0_i32_0, %c0_i32_1 : i32, i32, i32
  }
  func.func @transform_3(%arg0: i32) -> (i32, i32) {
    %c0_i32 = arith.constant 0 : i32
    %c0_i32_0 = arith.constant 0 : i32
    %c0_i32_1 = arith.constant 0 : i32
    return %c0_i32, %c0_i32_0 : i32, i32
  }
  func.func @transform_4(%arg0: i32) -> (i32, i32) {
    %c0_i32 = arith.constant 0 : i32
    %c0_i32_0 = arith.constant 0 : i32
    %c0_i32_1 = arith.constant 0 : i32
    return %c0_i32, %c0_i32_0 : i32, i32
  }
  func.func @transform_5(%arg0: i32) -> (i32, i32) {
    %c0_i32 = arith.constant 0 : i32
    %c0_i32_0 = arith.constant 0 : i32
    %c0_i32_1 = arith.constant 0 : i32
    return %c0_i32, %c0_i32_0 : i32, i32
  }
  func.func @transform_6(%arg0: i32) -> (i32, i32) {
    %c0_i32 = arith.constant 0 : i32
    %c0_i32_0 = arith.constant 0 : i32
    return %arg0, %c0_i32 : i32, i32
  }
}

</mosaic_0001>

<bundles_post_ra>
// kernel: _ae3_impl.1
= control target key start
LH: loop header
LB: loop body
LE: loop exit
PB: predicated region body
PF: predicated region fallthrough
CT: control target
= control target key end

     0   :  { %s2837_s21 = smov 0   ;;  %s2839_s22 = smov 0   ;;  %s3369_s0 = inlined_call_operand.vmem [shape: f32[200,16], index: 0, kind: input, shape index: {}]   ;;  %s3370_s1 = inlined_call_operand.vmem [shape: f32[16,128], index: 1, kind: input, shape index: {}]   ;;  %s3371_s2 = inlined_call_operand.vmem [shape: f32[4,128,128], index: 2, kind: input, shape index: {}]   ;;  %s3372_s3 = inlined_call_operand.vmem [shape: f32[128,16], index: 3, kind: input, shape index: {}]   ;;  %s3373_s4 = inlined_call_operand.vmem [shape: f32[5,128], index: 4, kind: input, shape index: {}]   ;;  %s3374_s5 = inlined_call_operand.vmem [shape: f32[1,16], index: 5, kind: input, shape index: {}]   ;;  %s3375_s6 = inlined_call_operand.vmem [shape: f32[200,16], index: 6, kind: output, shape index: {}]  }
   0x1   :  { %s2841_s23 = smov 0  }
   0x2 LB: > { %s2850_s24 = sadd.s32 4294967295, %s2768_s23   ;;  %s2852_s25 = sadd.s32 1, %s2768_s23   ;;  %s2768_s23 = sphi %s2841_s23, %s3382_s23   ;;  %s2764_s22 = sphi %s2839_s22, %s3381_s22   ;;  %s2760_s21 = sphi %s2837_s21, %s3380_s21  }
   0x3   : > { %s151_s26 = ssub.s32 %s2768_s23, %s2852_s25  ;;  %s154_s27 = sadd.s32 1, %s2764_s22 }
   0x4   : > { %p152_p0 = scmp.eq.s32.totalorder %s151_s26, 0  ;;  %p164_p1 = scmp.ne.s32.totalorder %s2764_s22, %s2760_s21 }
   0x5   : > { %p165_p2 = scmp.eq.s32.totalorder %s2850_s24, 1  ;;  %p1791_p3 = scmp.ge.s32.totalorder %s2768_s23, 1 }
   0x6   : > { %s2860_s28 = scalar_select %p152_p0, %s2764_s22, %s154_s27  }
   0x7   : > { %p2862_p4 = por %p165_p2, %p164_p1  ;;  %p221_p5 = scmp.lt.s32.totalorder %s2768_s23, 3 }
   0x9   : > { %p222_p6 = pnand %p1791_p3, %p221_p5 }
   0xa   : > { %v290_v0 = vld [vmem:[%s3370_s1] sm:$0xff] (!%p222_p6)  ;;  %v291_v1 = vld [vmem:[%s3370_s1 + $0x8] sm:$0xff] (!%p222_p6)  ;;  %s2873_s10 = sshll.u32 (!%p222_p6), %s2850_s24, 4  ;;  %v508_v5 = vld [vmem:[%s3371_s2 + $0x10] sm:$0xff] (!%p222_p6)  ;;  %vm296_vm0 = vcmask (!%p222_p6), 130048   ;;  %s251_s11 = sand.u32 (!%p222_p6), 1, %s2760_s21  }
   0xb   : > { %225 = sbr.rel (%p222_p6) target bundleno = 1435 (0x59b), region = 44  ;;  %v506_v2 = vld [vmem:[%s3371_s2] sm:$0xff] (!%p222_p6)  ;;  %v2382_v3 = vpack.c.bf16 (!%p222_p6), %v291_v1, %v290_v0  ;;  %p259_p7 = scmp.lt.s32.totalorder (!%p222_p6), %s2873_s10, 24  ;;  %v507_v4 = vld [vmem:[%s3371_s2 + $0x8] sm:$0xff] (!%p222_p6)  ;;  %v509_v6 = vld [vmem:[%s3371_s2 + $0x18] sm:$0xff] (!%p222_p6)  ;;  %v292_v0 = vlaneseq (!%p222_p6) }
   0xc   : > { %v2386_v7 = vpack.c.bf16 (!%p222_p6), %v507_v4, %v506_v2  ;;  %v2390_v8 = vpack.c.bf16 (!%p222_p6), %v509_v6, %v508_v5  ;;  %v510_v9 = vld [vmem:[%s3371_s2 + $0x20] sm:$0xff] (!%p222_p6)  ;;  %v511_v10 = vld [vmem:[%s3371_s2 + $0x28] sm:$0xff] (!%p222_p6)  ;;  %v512_v12 = vld [vmem:[%s3371_s2 + $0x30] sm:$0xff] (!%p222_p6)  ;;  %s1792_s12 = sshll.u32 (!%p222_p6), %s251_s11, 7 }
   0xd   : > { %2383 = vmatprep.subr.bf16.mxu0 (!%p222_p6), %v2382_v3  ;;  %v2394_v11 = vpack.c.bf16 (!%p222_p6), %v511_v10, %v510_v9  ;;  %v513_v13 = vld [vmem:[%s3371_s2 + $0x38] sm:$0xff] (!%p222_p6)  ;;  %v514_v20 = vld [vmem:[%s3371_s2 + $0x40] sm:$0xff] (!%p222_p6)  ;;  %v515_v21 = vld [vmem:[%s3371_s2 + $0x48] sm:$0xff] (!%p222_p6)  ;;  %v3004_v1 = vshrl.u32 (!%p222_p6), %v292_v0, 7  ;;  %s3233_s21 = scalar_lea.vmem (!%p222_p6), [#allocation2], %s1792_s12  }
   0xe   : > { %2385 = vmatpush3.bf16.msra.mxu0 (!%p222_p6), %v2382_v3  ;;  %2387 = vmatprep.subr.bf16.mxu1 (!%p222_p6), %v2386_v7  ;;  %v2398_v18 = vpack.c.bf16 (!%p222_p6), %v513_v13, %v512_v12  ;;  %v2402_v23 = vpack.c.bf16 (!%p222_p6), %v515_v21, %v514_v20  ;;  %v516_v25 = vld [vmem:[%s3371_s2 + $0x50] sm:$0xff] (!%p222_p6)  ;;  %v517_v26 = vld [vmem:[%s3371_s2 + $0x58] sm:$0xff] (!%p222_p6)  ;;  %v518_v30 = vld [vmem:[%s3371_s2 + $0x60] sm:$0xff] (!%p222_p6) }
   0xf   : > { %2389 = vmatpush3.bf16.msra.mxu1 (!%p222_p6), %v2386_v7  ;;  %v2406_v28 = vpack.c.bf16 (!%p222_p6), %v517_v26, %v516_v25  ;;  %v519_v31 = vld [vmem:[%s3371_s2 + $0x68] sm:$0xff] (!%p222_p6)  ;;  %v520_v40 = vld [vmem:[%s3371_s2 + $0x70] sm:$0xff] (!%p222_p6)  ;;  %v521_v41 = vld [vmem:[%s3371_s2 + $0x78] sm:$0xff] (!%p222_p6)  ;;  %v294_v2 = vsub.s32 (!%p222_p6), 0, %v3004_v1 }
  0x10   : > { %2391 = vmatprep.subr.bf16.mxu1 (!%p222_p6), %v2390_v8  ;;  %v2410_v33 = vpack.c.bf16 (!%p222_p6), %v519_v31, %v518_v30  ;;  %v2414_v42 = vpack.c.bf16 (!%p222_p6), %v521_v41, %v520_v40  ;;  %v1811_v43 = vld [vmem:[%s3371_s2 + $0x80] sm:$0xff] (!%p222_p6)  ;;  %v1812_v44 = vld [vmem:[%s3371_s2 + $0x88] sm:$0xff] (!%p222_p6)  ;;  %v1813_v45 = vld [vmem:[%s3371_s2 + $0x90] sm:$0xff] (!%p222_p6) }
  0x11   : > { %v2418_v46 = vpack.c.bf16 (!%p222_p6), %v1812_v44, %v1811_v43  ;;  %v1814_v47 = vld [vmem:[%s3371_s2 + $0x98] sm:$0xff] (!%p222_p6)  ;;  %v1815_v49 = vld [vmem:[%s3371_s2 + $0xa0] sm:$0xff] (!%p222_p6)  ;;  %v1816_v50 = vld [vmem:[%s3371_s2 + $0xa8] sm:$0xff] (!%p222_p6) }
  0x12   : > { %s260_s19 = scalar_select %p259_p7, %s2873_s10, 24  ;;  %v2422_v48 = vpack.c.bf16 %v1814_v47, %v1813_v45  ;;  %v2426_v51 = vpack.c.bf16 %v1816_v50, %v1815_v49  ;;  %v1817_v52 = vld [vmem:[%s3371_s2 + $0xb0] sm:$0xff]  ;;  %v1818_v53 = vld [vmem:[%s3371_s2 + $0xb8] sm:$0xff]  ;;  %v1819_v55 = vld [vmem:[%s3371_s2 + $0xc0] sm:$0xff] }
  0x13   : > { %2393 = vmatpush3.bf16.msra.mxu1 %v2390_v8  ;;  %2419 = vmatprep.subr.bf16.mxu0 %v2418_v46  ;;  %v2430_v54 = vpack.c.bf16 %v1818_v53, %v1817_v52  ;;  %v1820_v56 = vld [vmem:[%s3371_s2 + $0xc8] sm:$0xff]  ;;  %v1821_v58 = vld [vmem:[%s3371_s2 + $0xd0] sm:$0xff]  ;;  %v1822_v59 = vld [vmem:[%s3371_s2 + $0xd8] sm:$0xff]  ;;  %s1521_s13 = ssub.s32 (%p2862_p4), 25, %s2873_s10  ;;  %s1893_s14 = sshll.u32 (%p2862_p4), %s2850_s24, 7 }
  0x14   : > { %s1794_s30 = sshll.u32 %s260_s19, 3  ;;  %2395 = vmatprep.subr.bf16.mxu1 %v2394_v11  ;;  %v2434_v57 = vpack.c.bf16 %v1820_v56, %v1819_v55  ;;  %v2438_v60 = vpack.c.bf16 %v1822_v59, %v1821_v58  ;;  %v1823_v61 = vld [vmem:[%s3371_s2 + $0xe0] sm:$0xff]  ;;  %v1824_v62 = vld [vmem:[%s3371_s2 + $0xe8] sm:$0xff]  ;;  %v1825_v53 = vld [vmem:[%s3371_s2 + $0xf0] sm:$0xff]  ;;  %p1522_p8 = scmp.lt.s32.totalorder (%p2862_p4), %s1521_s13, 16 }
  0x15   : > { %s2898_s9 = scalar_lea.vmem %s3369_s0, %s1794_s30  ;;  %v2442_v63 = vpack.c.bf16 %v1824_v62, %v1823_v61  ;;  %v3010_v3 = vld [vmem:[%s3373_s4] sm:$0x1f]  ;;  %v1829_v58 = vld [vmem:[%s3371_s2 + $0x110] sm:$0xff]  ;;  %s3276_s17 = scalar_lea.vmem (%p2862_p4), %s3375_s6, %s1893_s14  }
  0x16   : > { %v274_v14 = vld [vmem:[%s2898_s9] sm:$0xff]  ;;  %v275_v15 = vld [vmem:[%s2898_s9 + $0x8] sm:$0xff]  ;;  %v276_v16 = vld [vmem:[%s2898_s9 + $0x10] sm:$0xff]  ;;  %v295_v4 = vrot.slane %v3010_v3, %v294_v2 }
  0x17   : > { %2078 = vmatprep.mubr.msk.f32.mxu0 %vm296_vm0, %v274_v14  ;;  %v277_v17 = vld [vmem:[%s2898_s9 + $0x18] sm:$0xff]  ;;  %v278_v19 = vld [vmem:[%s2898_s9 + $0x20] sm:$0xff]  ;;  %2397 = vmatpush3.bf16.msra.mxu1 %v2394_v11  ;;  %v279_v22 = vld [vmem:[%s2898_s9 + $0x28] sm:$0xff] }
  0x18   : > { %2079 = vmatmul.mubr.msk.f32.vlgmr.msra.gmra.mrb[0].mxu0 %vm296_vm0, %v275_v15  ;;  %2399 = vmatprep.subr.bf16.mxu1 %v2398_v18  ;;  %v280_v24 = vld [vmem:[%s2898_s9 + $0x30] sm:$0xff]  ;;  %v281_v27 = vld [vmem:[%s2898_s9 + $0x38] sm:$0xff]  ;;  %v282_v29 = vld [vmem:[%s2898_s9 + $0x40] sm:$0xff] }
  0x19   : > { %2081 = vmatprep.mubr.msk.f32.mxu0 %vm296_vm0, %v276_v16  ;;  %v283_v32 = vld [vmem:[%s2898_s9 + $0x48] sm:$0xff]  ;;  %v284_v34 = vld [vmem:[%s2898_s9 + $0x50] sm:$0xff]  ;;  %v285_v35 = vld [vmem:[%s2898_s9 + $0x58] sm:$0xff]  ;;  %2421 = vmatpush3.bf16.msra.mxu0 %v2418_v46 }
  0x1a   : > { %v286_v36 = vld [vmem:[%s2898_s9 + $0x60] sm:$0xff]  ;;  %v287_v37 = vld [vmem:[%s2898_s9 + $0x68] sm:$0xff]  ;;  %v288_v38 = vld [vmem:[%s2898_s9 + $0x70] sm:$0xff]  ;;  %2423 = vmatprep.subr.bf16.mxu0 %v2422_v48 }
  0x1b   : > { %2401 = vmatpush3.bf16.msra.mxu1 %v2398_v18  ;;  %v289_v39 = vld [vmem:[%s2898_s9 + $0x78] sm:$0xff]  ;;  %v1827_v56 = vld [vmem:[%s3371_s2 + $0x100] sm:$0xff]  ;;  %v1833_v2 = vld [vmem:[%s3371_s2 + $0x130] sm:$0xff] }
  0x1c   : > { %2082 = vmatmul.mubr.msk.f32.gmra.mrb[2].mxu0 %vm296_vm0, %v277_v17  ;;  %2403 = vmatprep.subr.bf16.mxu1 %v2402_v23  ;;  %v1831_v62 = vld [vmem:[%s3371_s2 + $0x120] sm:$0xff] }
  0x1d   : > { %2084 = vmatprep.mubr.msk.f32.mxu0 %vm296_vm0, %v278_v19  ;;  %2425 = vmatpush3.bf16.msra.mxu0 %v2422_v48 }
  0x1e   : > { %2427 = vmatprep.subr.bf16.mxu0 %v2426_v51 }
  0x1f   : > { %2405 = vmatpush3.bf16.msra.mxu1 %v2402_v23 }
  0x20   : > { %2085 = vmatmul.mubr.msk.f32.gmra.mrb[4].mxu0 %vm296_vm0, %v279_v22  ;;  %2407 = vmatprep.subr.bf16.mxu1 %v2406_v28 }
  0x21   : > { %2087 = vmatprep.mubr.msk.f32.mxu0 %vm296_vm0, %v280_v24  ;;  %2429 = vmatpush3.bf16.msra.mxu0 %v2426_v51 }
  0x22   : > { %2431 = vmatprep.subr.bf16.mxu0 %v2430_v54 }
  0x23   : > { %2409 = vmatpush3.bf16.msra.mxu1 %v2406_v28 }
  0x24   : > { %2088 = vmatmul.mubr.msk.f32.gmra.mrb[6].mxu0 %vm296_vm0, %v281_v27  ;;  %2411 = vmatprep.subr.bf16.mxu1 %v2410_v33 }
  0x25   : > { %2090 = vmatprep.mubr.msk.f32.mxu0 %vm296_vm0, %v282_v29  ;;  %2433 = vmatpush3.bf16.msra.mxu0 %v2430_v54  ;;  %v1826_v54 = vld [vmem:[%s3371_s2 + $0xf8] sm:$0xff] }
  0x26   : > { %2435 = vmatprep.subr.bf16.mxu0 %v2434_v57  ;;  %v2446_v55 = vpack.c.bf16 %v1826_v54, %v1825_v53 }
  0x27   : > { %2413 = vmatpush3.bf16.msra.mxu1 %v2410_v33 }
  0x28   : > { %2091 = vmatmul.mubr.msk.f32.gmra.mrb[8].mxu0 %vm296_vm0, %v283_v32  ;;  %2415 = vmatprep.subr.bf16.mxu1 %v2414_v42 }
  0x29   : > { %2093 = vmatprep.mubr.msk.f32.mxu0 %vm296_vm0, %v284_v34  ;;  %2437 = vmatpush3.bf16.msra.mxu0 %v2434_v57  ;;  %v1828_v57 = vld [vmem:[%s3371_s2 + $0x108] sm:$0xff] }
  0x2a   : > { %2439 = vmatprep.subr.bf16.mxu0 %v2438_v60  ;;  %v2450_v59 = vpack.c.bf16 %v1828_v57, %v1827_v56 }
  0x2b   : > { %2417 = vmatpush3.bf16.msra.mxu1 %v2414_v42 }
  0x2c   : > { %2094 = vmatmul.mubr.msk.f32.gmra.mrb[10].mxu0 %vm296_vm0, %v285_v35  ;;  %2451 = vmatprep.subr.bf16.mxu1 %v2450_v59 }
  0x2d   : > { %2096 = vmatprep.mubr.msk.f32.mxu0 %vm296_vm0, %v286_v36  ;;  %2441 = vmatpush3.bf16.msra.mxu0 %v2438_v60  ;;  %v1830_v60 = vld [vmem:[%s3371_s2 + $0x118] sm:$0xff] }
  0x2e   : > { %2443 = vmatprep.subr.bf16.mxu0 %v2442_v63  ;;  %v2454_v61 = vpack.c.bf16 %v1830_v60, %v1829_v58 }
  0x30   : > { %2097 = vmatmul.mubr.msk.f32.gmra.mrb[12].mxu0 %vm296_vm0, %v287_v37 }
  0x31   : > { %2099 = vmatprep.mubr.msk.f32.mxu0 %vm296_vm0, %v288_v38  ;;  %2445 = vmatpush3.bf16.msra.mxu0 %v2442_v63  ;;  %v1832_v63 = vld [vmem:[%s3371_s2 + $0x128] sm:$0xff] }
  0x32   : > { %2447 = vmatprep.subr.bf16.mxu0 %v2446_v55  ;;  %v2458_v0 = vpack.c.bf16 %v1832_v63, %v1831_v62 }
  0x34   : > { %2100 = vmatmul.mubr.msk.f32.gmra.mrb[14].mxu0 %vm296_vm0, %v289_v39 }
  0x35   : > { %2449 = vmatpush3.bf16.msra.mxu0 %v2446_v55 }
  0xeb   : > { %v2080_v5 = vpop.f32.mrb[0].mxu0 }
  0xec   : > { %v417_v6 = vadd.f32 %v2080_v5, %v295_v4  ;;  %v411_v7 = vpop.f32.mrb[1].mxu0 }
  0xed   : > { %v412_v8 = vadd.f32 %v411_v7, %v295_v4  ;;  %v1836_v7 = vld [vmem:[%s3371_s2 + $0x148] sm:$0xff] }
  0xee   : > { %v491_v11 = vmax.f32 %v417_v6, 0.0  ;;  %v1835_v6 = vld [vmem:[%s3371_s2 + $0x140] sm:$0xff] }
  0xef   : > { %v2083_v9 = vpop.f32.mrb[2].mxu0  ;;  %v490_v10 = vmax.f32 %v412_v8, 0.0  ;;  %v2466_v8 = vpack.c.bf16 %v1836_v7, %v1835_v6  ;;  %v1843_v6 = vld [vmem:[%s3371_s2 + $0x180] sm:$0xff]  ;;  %v1844_v7 = vld [vmem:[%s3371_s2 + $0x188] sm:$0xff] }
  0xf0   : > { %v427_v12 = vadd.f32 %v2083_v9, %v295_v4  ;;  %v421_v13 = vpop.f32.mrb[3].mxu0  ;;  %v1837_v9 = vld [vmem:[%s3371_s2 + $0x150] sm:$0xff] }
  0xf1   : > { %v422_v14 = vadd.f32 %v421_v13, %v295_v4  ;;  %2134 = vmatprep.mubr.f32.mxu1 %v490_v10  ;;  %v1838_v10 = vld [vmem:[%s3371_s2 + $0x158] sm:$0xff]  ;;  %v1840_v13 = vld [vmem:[%s3371_s2 + $0x168] sm:$0xff] }
  0xf2   : > { %2135 = vmatmul.mubr.f32.vlgmr.msra.gmra.mrb[0].mxu1 %v491_v11  ;;  %v493_v17 = vmax.f32 %v427_v12, 0.0  ;;  %v2470_v11 = vpack.c.bf16 %v1838_v10, %v1837_v9  ;;  %v1839_v12 = vld [vmem:[%s3371_s2 + $0x160] sm:$0xff]  ;;  %v2482_v9 = vpack.c.bf16 %v1844_v7, %v1843_v6  ;;  %v1846_v10 = vld [vmem:[%s3371_s2 + $0x198] sm:$0xff] }
  0xf3   : > { %v492_v15 = vmax.f32 %v422_v14, 0.0  ;;  %v2086_v16 = vpop.f32.mrb[4].mxu0  ;;  %2453 = vmatpush3.bf16.msra.mxu1 %v2450_v59  ;;  %v2474_v14 = vpack.c.bf16 %v1840_v13, %v1839_v12  ;;  %v1847_v12 = vld [vmem:[%s3371_s2 + $0x1a0] sm:$0xff]  ;;  %v1848_v13 = vld [vmem:[%s3371_s2 + $0x1a8] sm:$0xff] }
  0xf4   : > { %v437_v18 = vadd.f32 %v2086_v16, %v295_v4  ;;  %v431_v19 = vpop.f32.mrb[5].mxu0  ;;  %2455 = vmatprep.subr.bf16.mxu1 %v2454_v61  ;;  %2483 = vmatprep.subr.bf16.mxu0 %v2482_v9 }
  0xf5   : > { %v432_v20 = vadd.f32 %v431_v19, %v295_v4  ;;  %2137 = vmatprep.mubr.f32.mxu1 %v492_v15  ;;  %v524_v15 = vsub.s32 1, %v3004_v1 }
  0xf6   : > { %2138 = vmatmul.mubr.f32.gmra.mrb[2].mxu1 %v493_v17  ;;  %v495_v23 = vmax.f32 %v437_v18, 0.0 }
  0xf7   : > { %v494_v21 = vmax.f32 %v432_v20, 0.0  ;;  %v2089_v22 = vpop.f32.mrb[6].mxu0  ;;  %2457 = vmatpush3.bf16.msra.mxu1 %v2454_v61  ;;  %v525_v16 = vrot.slane %v3010_v3, %v524_v15  ;;  %v1849_v15 = vld [vmem:[%s3371_s2 + $0x1b0] sm:$0xff] }
  0xf8   : > { %v447_v24 = vadd.f32 %v2089_v22, %v295_v4  ;;  %v441_v25 = vpop.f32.mrb[7].mxu0  ;;  %2459 = vmatprep.subr.bf16.mxu1 %v2458_v0 }
  0xf9   : > { %v442_v26 = vadd.f32 %v441_v25, %v295_v4  ;;  %2140 = vmatprep.mubr.f32.mxu1 %v494_v21 }
  0xfa   : > { %2141 = vmatmul.mubr.f32.gmra.mrb[4].mxu1 %v495_v23  ;;  %v497_v29 = vmax.f32 %v447_v24, 0.0 }
  0xfb   : > { %v496_v27 = vmax.f32 %v442_v26, 0.0  ;;  %v2092_v28 = vpop.f32.mrb[8].mxu0  ;;  %2461 = vmatpush3.bf16.msra.mxu1 %v2458_v0 }
  0xfc   : > { %v457_v30 = vadd.f32 %v2092_v28, %v295_v4  ;;  %v451_v31 = vpop.f32.mrb[9].mxu0 }
  0xfd   : > { %v452_v32 = vadd.f32 %v451_v31, %v295_v4  ;;  %2143 = vmatprep.mubr.f32.mxu1 %v496_v27 }
  0xfe   : > { %2144 = vmatmul.mubr.f32.gmra.mrb[6].mxu1 %v497_v29  ;;  %v499_v35 = vmax.f32 %v457_v30, 0.0 }
  0xff   : > { %v498_v33 = vmax.f32 %v452_v32, 0.0  ;;  %v2095_v34 = vpop.f32.mrb[10].mxu0 }
 0x100   : > { %v467_v36 = vadd.f32 %v2095_v34, %v295_v4  ;;  %v461_v37 = vpop.f32.mrb[11].mxu0 }
 0x101   : > { %v462_v38 = vadd.f32 %v461_v37, %v295_v4  ;;  %2146 = vmatprep.mubr.f32.mxu1 %v498_v33 }
 0x102   : > { %2147 = vmatmul.mubr.f32.gmra.mrb[8].mxu1 %v499_v35  ;;  %v501_v41 = vmax.f32 %v467_v36, 0.0 }
 0x103   : > { %v500_v39 = vmax.f32 %v462_v38, 0.0  ;;  %v2098_v40 = vpop.f32.mrb[12].mxu0 }
 0x104   : > { %v477_v42 = vadd.f32 %v2098_v40, %v295_v4  ;;  %v471_v43 = vpop.f32.mrb[13].mxu0 }
 0x105   : > { %v472_v44 = vadd.f32 %v471_v43, %v295_v4  ;;  %2149 = vmatprep.mubr.f32.mxu1 %v500_v39 }
 0x106   : > { %2150 = vmatmul.mubr.f32.gmra.mrb[10].mxu1 %v501_v41  ;;  %v503_v47 = vmax.f32 %v477_v42, 0.0 }
 0x107   : > { %v502_v45 = vmax.f32 %v472_v44, 0.0  ;;  %v2101_v46 = vpop.f32.mrb[14].mxu0 }
 0x108   : > { %v487_v48 = vadd.f32 %v2101_v46, %v295_v4  ;;  %v481_v49 = vpop.f32.mrb[15].mxu0 }
 0x109   : > { %v482_v50 = vadd.f32 %v481_v49, %v295_v4  ;;  %2152 = vmatprep.mubr.f32.mxu1 %v502_v45  ;;  %v1834_v4 = vld [vmem:[%s3371_s2 + $0x138] sm:$0xff] }
 0x10a   : > { %2153 = vmatmul.mubr.f32.gmra.mrb[12].mxu1 %v503_v47  ;;  %v505_v52 = vmax.f32 %v487_v48, 0.0  ;;  %v2462_v5 = vpack.c.bf16 %v1834_v4, %v1833_v2  ;;  %v1841_v2 = vld [vmem:[%s3371_s2 + $0x170] sm:$0xff]  ;;  %v1842_v4 = vld [vmem:[%s3371_s2 + $0x178] sm:$0xff] }
 0x10b   : > { %v504_v51 = vmax.f32 %v482_v50, 0.0 }
 0x10c   : > { %2463 = vmatprep.subr.bf16.mxu1 %v2462_v5 }
 0x10d   : > { %2155 = vmatprep.mubr.f32.mxu1 %v504_v51  ;;  %2465 = vmatpush3.bf16.msra.mxu1 %v2462_v5  ;;  %v2478_v5 = vpack.c.bf16 %v1842_v4, %v1841_v2 }
 0x10e   : > { %2156 = vmatmul.mubr.f32.gmra.mrb[14].mxu1 %v505_v52  ;;  %2467 = vmatprep.subr.bf16.mxu1 %v2466_v8 }
 0x111   : > { %2469 = vmatpush3.bf16.msra.mxu1 %v2466_v8  ;;  %v1845_v8 = vld [vmem:[%s3371_s2 + $0x190] sm:$0xff] }
 0x112   : > { %2471 = vmatprep.subr.bf16.mxu1 %v2470_v11 }
 0x115   : > { %2473 = vmatpush3.bf16.msra.mxu1 %v2470_v11  ;;  %v2486_v11 = vpack.c.bf16 %v1846_v10, %v1845_v8 }
 0x116   : > { %2475 = vmatprep.subr.bf16.mxu1 %v2474_v14 }
 0x119   : > { %2477 = vmatpush3.bf16.msra.mxu1 %v2474_v14  ;;  %v2490_v14 = vpack.c.bf16 %v1848_v13, %v1847_v12 }
 0x11a   : > { %2479 = vmatprep.subr.bf16.mxu1 %v2478_v5 }
 0x11d   : > { %2481 = vmatpush3.bf16.msra.mxu1 %v2478_v5 }
 0x1c5   : > { %v2136_v17 = vpop.f32.mrb[0].mxu1 }
 0x1c6   : > { %v598_v18 = vadd.f32 %v2136_v17, %v525_v16  ;;  %v592_v19 = vpop.f32.mrb[1].mxu1 }
 0x1c7   : > { %v593_v20 = vadd.f32 %v592_v19, %v525_v16  ;;  %v1852_v19 = vld [vmem:[%s3371_s2 + $0x1c8] sm:$0xff] }
 0x1c8   : > { %v672_v23 = vmax.f32 %v598_v18, 0.0  ;;  %v1851_v18 = vld [vmem:[%s3371_s2 + $0x1c0] sm:$0xff] }
 0x1c9   : > { %v671_v21 = vmax.f32 %v593_v20, 0.0  ;;  %v2139_v22 = vpop.f32.mrb[2].mxu1  ;;  %v2498_v20 = vpack.c.bf16 %v1852_v19, %v1851_v18  ;;  %v1233_v18 = vld [vmem:[%s3372_s3] sm:$0xff]  ;;  %v1234_v19 = vld [vmem:[%s3372_s3 + $0x8] sm:$0xff] }
 0x1ca   : > { %v608_v24 = vadd.f32 %v2139_v22, %v525_v16  ;;  %v602_v25 = vpop.f32.mrb[3].mxu1  ;;  %v1854_v22 = vld [vmem:[%s3371_s2 + $0x1d8] sm:$0xff] }
 0x1cb   : > { %v603_v26 = vadd.f32 %v602_v25, %v525_v16  ;;  %2190 = vmatprep.mubr.f32.mxu0 %v671_v21  ;;  %v1853_v21 = vld [vmem:[%s3371_s2 + $0x1d0] sm:$0xff]  ;;  %v1856_v25 = vld [vmem:[%s3371_s2 + $0x1e8] sm:$0xff] }
 0x1cc   : > { %2191 = vmatmul.mubr.f32.vlgmr.msra.gmra.mrb[16].mxu0 %v672_v23  ;;  %v674_v29 = vmax.f32 %v608_v24, 0.0  ;;  %v2502_v23 = vpack.c.bf16 %v1854_v22, %v1853_v21  ;;  %v1855_v24 = vld [vmem:[%s3371_s2 + $0x1e0] sm:$0xff]  ;;  %v2514_v21 = vpack.c.bf16 %v1234_v19, %v1233_v18  ;;  %v1236_v22 = vld [vmem:[%s3372_s3 + $0x18] sm:$0xff] }
 0x1cd   : > { %v673_v27 = vmax.f32 %v603_v26, 0.0  ;;  %v2142_v28 = vpop.f32.mrb[4].mxu1  ;;  %2485 = vmatpush3.bf16.msra.mxu0 %v2482_v9  ;;  %v2506_v26 = vpack.c.bf16 %v1856_v25, %v1855_v24  ;;  %v1237_v24 = vld [vmem:[%s3372_s3 + $0x20] sm:$0xff]  ;;  %v1238_v25 = vld [vmem:[%s3372_s3 + $0x28] sm:$0xff] }
 0x1ce   : > { %v618_v30 = vadd.f32 %v2142_v28, %v525_v16  ;;  %v612_v31 = vpop.f32.mrb[5].mxu1  ;;  %2487 = vmatprep.subr.bf16.mxu0 %v2486_v11  ;;  %2546 = vmatprep.subr.bf16.mxu1 %v2514_v21 }
 0x1cf   : > { %v613_v32 = vadd.f32 %v612_v31, %v525_v16  ;;  %2193 = vmatprep.mubr.f32.mxu0 %v673_v27  ;;  %v706_v27 = vsub.s32 2, %v3004_v1 }
 0x1d0   : > { %2194 = vmatmul.mubr.f32.gmra.mrb[18].mxu0 %v674_v29  ;;  %v676_v35 = vmax.f32 %v618_v30, 0.0 }
 0x1d1   : > { %v675_v33 = vmax.f32 %v613_v32, 0.0  ;;  %v2145_v34 = vpop.f32.mrb[6].mxu1  ;;  %2489 = vmatpush3.bf16.msra.mxu0 %v2486_v11  ;;  %v707_v28 = vrot.slane %v3010_v3, %v706_v27  ;;  %v1239_v27 = vld [vmem:[%s3372_s3 + $0x30] sm:$0xff] }
 0x1d2   : > { %v628_v36 = vadd.f32 %v2145_v34, %v525_v16  ;;  %v622_v37 = vpop.f32.mrb[7].mxu1  ;;  %2491 = vmatprep.subr.bf16.mxu0 %v2490_v14 }
 0x1d3   : > { %v623_v38 = vadd.f32 %v622_v37, %v525_v16  ;;  %2196 = vmatprep.mubr.f32.mxu0 %v675_v33 }
 0x1d4   : > { %2197 = vmatmul.mubr.f32.gmra.mrb[20].mxu0 %v676_v35  ;;  %v678_v41 = vmax.f32 %v628_v36, 0.0 }
 0x1d5   : > { %v677_v39 = vmax.f32 %v623_v38, 0.0  ;;  %v2148_v40 = vpop.f32.mrb[8].mxu1  ;;  %2493 = vmatpush3.bf16.msra.mxu0 %v2490_v14 }
 0x1d6   : > { %v638_v42 = vadd.f32 %v2148_v40, %v525_v16  ;;  %v632_v43 = vpop.f32.mrb[9].mxu1 }
 0x1d7   : > { %v633_v44 = vadd.f32 %v632_v43, %v525_v16  ;;  %2199 = vmatprep.mubr.f32.mxu0 %v677_v39 }
 0x1d8   : > { %2200 = vmatmul.mubr.f32.gmra.mrb[22].mxu0 %v678_v41  ;;  %v680_v47 = vmax.f32 %v638_v42, 0.0 }
 0x1d9   : > { %v679_v45 = vmax.f32 %v633_v44, 0.0  ;;  %v2151_v46 = vpop.f32.mrb[10].mxu1 }
 0x1da   : > { %v648_v48 = vadd.f32 %v2151_v46, %v525_v16  ;;  %v642_v49 = vpop.f32.mrb[11].mxu1 }
 0x1db   : > { %v643_v50 = vadd.f32 %v642_v49, %v525_v16  ;;  %2202 = vmatprep.mubr.f32.mxu0 %v679_v45 }
 0x1dc   : > { %2203 = vmatmul.mubr.f32.gmra.mrb[24].mxu0 %v680_v47  ;;  %v682_v53 = vmax.f32 %v648_v48, 0.0 }
 0x1dd   : > { %v681_v51 = vmax.f32 %v643_v50, 0.0  ;;  %v2154_v52 = vpop.f32.mrb[12].mxu1 }
 0x1de   : > { %v658_v54 = vadd.f32 %v2154_v52, %v525_v16  ;;  %v652_v55 = vpop.f32.mrb[13].mxu1 }
 0x1df   : > { %v653_v56 = vadd.f32 %v652_v55, %v525_v16  ;;  %2205 = vmatprep.mubr.f32.mxu0 %v681_v51 }
 0x1e0   : > { %2206 = vmatmul.mubr.f32.gmra.mrb[26].mxu0 %v682_v53  ;;  %v684_v59 = vmax.f32 %v658_v54, 0.0 }
 0x1e1   : > { %v683_v57 = vmax.f32 %v653_v56, 0.0  ;;  %v2157_v58 = vpop.f32.mrb[14].mxu1 }
 0x1e2   : > { %v668_v60 = vadd.f32 %v2157_v58, %v525_v16  ;;  %v662_v61 = vpop.f32.mrb[15].mxu1 }
 0x1e3   : > { %v663_v62 = vadd.f32 %v662_v61, %v525_v16  ;;  %2208 = vmatprep.mubr.f32.mxu0 %v683_v57  ;;  %v1850_v16 = vld [vmem:[%s3371_s2 + $0x1b8] sm:$0xff] }
 0x1e4   : > { %2209 = vmatmul.mubr.f32.gmra.mrb[28].mxu0 %v684_v59  ;;  %v686_v0 = vmax.f32 %v668_v60, 0.0  ;;  %v2494_v17 = vpack.c.bf16 %v1850_v16, %v1849_v15  ;;  %v1857_v15 = vld [vmem:[%s3371_s2 + $0x1f0] sm:$0xff]  ;;  %v1858_v16 = vld [vmem:[%s3371_s2 + $0x1f8] sm:$0xff] }
 0x1e5   : > { %v685_v63 = vmax.f32 %v663_v62, 0.0 }
 0x1e6   : > { %2495 = vmatprep.subr.bf16.mxu0 %v2494_v17 }
 0x1e7   : > { %2211 = vmatprep.mubr.f32.mxu0 %v685_v63  ;;  %2497 = vmatpush3.bf16.msra.mxu0 %v2494_v17  ;;  %v2510_v17 = vpack.c.bf16 %v1858_v16, %v1857_v15 }
 0x1e8   : > { %2212 = vmatmul.mubr.f32.gmra.mrb[30].mxu0 %v686_v0  ;;  %2499 = vmatprep.subr.bf16.mxu0 %v2498_v20 }
 0x1eb   : > { %2501 = vmatpush3.bf16.msra.mxu0 %v2498_v20  ;;  %v1235_v20 = vld [vmem:[%s3372_s3 + $0x10] sm:$0xff] }
 0x1ec   : > { %2503 = vmatprep.subr.bf16.mxu0 %v2502_v23 }
 0x1ef   : > { %2505 = vmatpush3.bf16.msra.mxu0 %v2502_v23  ;;  %v2518_v23 = vpack.c.bf16 %v1236_v22, %v1235_v20 }
 0x1f0   : > { %2507 = vmatprep.subr.bf16.mxu0 %v2506_v26 }
 0x1f3   : > { %2509 = vmatpush3.bf16.msra.mxu0 %v2506_v26  ;;  %v2522_v26 = vpack.c.bf16 %v1238_v25, %v1237_v24 }
 0x1f4   : > { %2511 = vmatprep.subr.bf16.mxu0 %v2510_v17 }
 0x1f7   : > { %2513 = vmatpush3.bf16.msra.mxu0 %v2510_v17 }
 0x1f8   : > { %2515 = vmatprep.subr.bf16.mxu0 %v2514_v21 }
 0x29f   : > { %v2192_v29 = vpop.f32.mrb[16].mxu0 }
 0x2a0   : > { %v780_v30 = vadd.f32 %v2192_v29, %v707_v28  ;;  %v774_v31 = vpop.f32.mrb[17].mxu0 }
 0x2a1   : > { %v775_v32 = vadd.f32 %v774_v31, %v707_v28  ;;  %v1242_v31 = vld [vmem:[%s3372_s3 + $0x48] sm:$0xff] }
 0x2a2   : > { %v854_v35 = vmax.f32 %v780_v30, 0.0  ;;  %v1241_v30 = vld [vmem:[%s3372_s3 + $0x40] sm:$0xff] }
 0x2a3   : > { %v853_v33 = vmax.f32 %v775_v32, 0.0  ;;  %v2195_v34 = vpop.f32.mrb[18].mxu0  ;;  %v3152_v32 = vpack.c.bf16 %v1242_v31, %v1241_v30  ;;  %v1070_v30 = vsub.s32 4, %v3004_v1 }
 0x2a4   : > { %v790_v36 = vadd.f32 %v2195_v34, %v707_v28  ;;  %v784_v37 = vpop.f32.mrb[19].mxu0  ;;  %v1244_v34 = vld [vmem:[%s3372_s3 + $0x58] sm:$0xff] }
 0x2a5   : > { %v785_v38 = vadd.f32 %v784_v37, %v707_v28  ;;  %2246 = vmatprep.mubr.f32.mxu1 %v853_v33  ;;  %v1243_v33 = vld [vmem:[%s3372_s3 + $0x50] sm:$0xff]  ;;  %v1246_v37 = vld [vmem:[%s3372_s3 + $0x68] sm:$0xff]  ;;  %v1071_v31 = vrot.slane %v3010_v3, %v1070_v30 }
 0x2a6   : > { %2247 = vmatmul.mubr.f32.vlgmr.msra.gmra.mrb[16].mxu1 %v854_v35  ;;  %v856_v41 = vmax.f32 %v790_v36, 0.0  ;;  %v3162_v35 = vpack.c.bf16 %v1244_v34, %v1243_v33  ;;  %v1245_v36 = vld [vmem:[%s3372_s3 + $0x60] sm:$0xff] }
 0x2a7   : > { %v855_v39 = vmax.f32 %v785_v38, 0.0  ;;  %v2198_v40 = vpop.f32.mrb[20].mxu0  ;;  %2554 = vmatpush3.bf16.msra.mxu1 %v2514_v21  ;;  %v3172_v38 = vpack.c.bf16 %v1246_v37, %v1245_v36 }
 0x2a8   : > { %v800_v42 = vadd.f32 %v2198_v40, %v707_v28  ;;  %v794_v43 = vpop.f32.mrb[21].mxu0  ;;  %2547 = vmatprep.subr.bf16.mxu1 %v2518_v23 }
 0x2a9   : > { %v795_v44 = vadd.f32 %v794_v43, %v707_v28  ;;  %2249 = vmatprep.mubr.f32.mxu1 %v855_v39  ;;  %v888_v39 = vsub.s32 3, %v3004_v1 }
 0x2aa   : > { %2250 = vmatmul.mubr.f32.gmra.mrb[18].mxu1 %v856_v41  ;;  %v858_v47 = vmax.f32 %v800_v42, 0.0 }
 0x2ab   : > { %v857_v45 = vmax.f32 %v795_v44, 0.0  ;;  %v2201_v46 = vpop.f32.mrb[22].mxu0  ;;  %2555 = vmatpush3.bf16.msra.mxu1 %v2518_v23  ;;  %v3179_v40 = vrot.slane %v3010_v3, %v888_v39 }
 0x2ac   : > { %v810_v48 = vadd.f32 %v2201_v46, %v707_v28  ;;  %v804_v49 = vpop.f32.mrb[23].mxu0  ;;  %2548 = vmatprep.subr.bf16.mxu1 %v2522_v26 }
 0x2ad   : > { %v805_v50 = vadd.f32 %v804_v49, %v707_v28  ;;  %2252 = vmatprep.mubr.f32.mxu1 %v857_v45 }
 0x2ae   : > { %2253 = vmatmul.mubr.f32.gmra.mrb[20].mxu1 %v858_v47  ;;  %v860_v53 = vmax.f32 %v810_v48, 0.0 }
 0x2af   : > { %v859_v51 = vmax.f32 %v805_v50, 0.0  ;;  %v2204_v52 = vpop.f32.mrb[24].mxu0  ;;  %2556 = vmatpush3.bf16.msra.mxu1 %v2522_v26 }
 0x2b0   : > { %v820_v54 = vadd.f32 %v2204_v52, %v707_v28  ;;  %v814_v55 = vpop.f32.mrb[25].mxu0 }
 0x2b1   : > { %v815_v56 = vadd.f32 %v814_v55, %v707_v28  ;;  %2255 = vmatprep.mubr.f32.mxu1 %v859_v51 }
 0x2b2   : > { %2256 = vmatmul.mubr.f32.gmra.mrb[22].mxu1 %v860_v53  ;;  %v862_v59 = vmax.f32 %v820_v54, 0.0 }
 0x2b3   : > { %v861_v57 = vmax.f32 %v815_v56, 0.0  ;;  %v2207_v58 = vpop.f32.mrb[26].mxu0 }
 0x2b4   : > { %v830_v60 = vadd.f32 %v2207_v58, %v707_v28  ;;  %v824_v61 = vpop.f32.mrb[27].mxu0 }
 0x2b5   : > { %v825_v62 = vadd.f32 %v824_v61, %v707_v28  ;;  %2258 = vmatprep.mubr.f32.mxu1 %v861_v57 }
 0x2b6   : > { %2259 = vmatmul.mubr.f32.gmra.mrb[24].mxu1 %v862_v59  ;;  %v864_v2 = vmax.f32 %v830_v60, 0.0 }
 0x2b7   : > { %v863_v63 = vmax.f32 %v825_v62, 0.0  ;;  %v2210_v0 = vpop.f32.mrb[28].mxu0 }
 0x2b8   : > { %v840_v4 = vadd.f32 %v2210_v0, %v707_v28  ;;  %v834_v5 = vpop.f32.mrb[29].mxu0 }
 0x2b9   : > { %v835_v6 = vadd.f32 %v834_v5, %v707_v28  ;;  %2261 = vmatprep.mubr.f32.mxu1 %v863_v63 }
 0x2ba   : > { %2262 = vmatmul.mubr.f32.gmra.mrb[26].mxu1 %v864_v2  ;;  %v866_v9 = vmax.f32 %v840_v4, 0.0 }
 0x2bb   : > { %v865_v7 = vmax.f32 %v835_v6, 0.0  ;;  %v2213_v8 = vpop.f32.mrb[30].mxu0 }
 0x2bc   : > { %v850_v10 = vadd.f32 %v2213_v8, %v707_v28  ;;  %v844_v11 = vpop.f32.mrb[31].mxu0 }
 0x2bd   : > { %v845_v12 = vadd.f32 %v844_v11, %v707_v28  ;;  %2264 = vmatprep.mubr.f32.mxu1 %v865_v7  ;;  %v1240_v28 = vld [vmem:[%s3372_s3 + $0x38] sm:$0xff] }
 0x2be   : > { %2265 = vmatmul.mubr.f32.gmra.mrb[28].mxu1 %v866_v9  ;;  %v868_v14 = vmax.f32 %v850_v10, 0.0  ;;  %v3143_v29 = vpack.c.bf16 %v1240_v28, %v1239_v27  ;;  %v1247_v27 = vld [vmem:[%s3372_s3 + $0x70] sm:$0xff]  ;;  %v1248_v28 = vld [vmem:[%s3372_s3 + $0x78] sm:$0xff] }
 0x2bf   : > { %v867_v13 = vmax.f32 %v845_v12, 0.0 }
 0x2c0   : > { %2549 = vmatprep.subr.bf16.mxu1 %v3143_v29 }
 0x2c1   : > { %2267 = vmatprep.mubr.f32.mxu1 %v867_v13  ;;  %2557 = vmatpush3.bf16.msra.mxu1 %v3143_v29 }
 0x2c2   : > { %2268 = vmatmul.mubr.f32.gmra.mrb[30].mxu1 %v868_v14  ;;  %2550 = vmatprep.subr.bf16.mxu1 %v3152_v32 }
 0x2c5   : > { %2558 = vmatpush3.bf16.msra.mxu1 %v3152_v32 }
 0x2c6   : > { %2551 = vmatprep.subr.bf16.mxu1 %v3162_v35 }
 0x2c9   : > { %2559 = vmatpush3.bf16.msra.mxu1 %v3162_v35 }
 0x2ca   : > { %2552 = vmatprep.subr.bf16.mxu1 %v3172_v38 }
 0x2cd   : > { %2560 = vmatpush3.bf16.msra.mxu1 %v3172_v38 }
 0x379   : > { %v2248_v41 = vpop.f32.mrb[16].mxu1 }
 0x37a   : > { %v962_v42 = vadd.f32 %v2248_v41, %v3179_v40  ;;  %v956_v43 = vpop.f32.mrb[17].mxu1 }
 0x37b   : > { %v957_v44 = vadd.f32 %v956_v43, %v3179_v40 }
 0x37c   : > { %v1036_v47 = vmax.f32 %v962_v42, 0.0 }
 0x37d   : > { %v1035_v45 = vmax.f32 %v957_v44, 0.0  ;;  %v2251_v46 = vpop.f32.mrb[18].mxu1 }
 0x37e   : > { %v972_v48 = vadd.f32 %v2251_v46, %v3179_v40  ;;  %v966_v49 = vpop.f32.mrb[19].mxu1 }
 0x37f   : > { %v967_v50 = vadd.f32 %v966_v49, %v3179_v40  ;;  %2302 = vmatprep.mubr.f32.mxu0 %v1035_v45 }
 0x380   : > { %2303 = vmatmul.mubr.f32.vlgmr.msra.gmra.mrb[32].mxu0 %v1036_v47  ;;  %v1038_v53 = vmax.f32 %v972_v48, 0.0 }
 0x381   : > { %v1037_v51 = vmax.f32 %v967_v50, 0.0  ;;  %v2254_v52 = vpop.f32.mrb[20].mxu1  ;;  %2517 = vmatpush3.bf16.msra.mxu0 %v2514_v21 }
 0x382   : > { %v982_v54 = vadd.f32 %v2254_v52, %v3179_v40  ;;  %v976_v55 = vpop.f32.mrb[21].mxu1  ;;  %2519 = vmatprep.subr.bf16.mxu0 %v2518_v23 }
 0x383   : > { %v977_v56 = vadd.f32 %v976_v55, %v3179_v40  ;;  %2305 = vmatprep.mubr.f32.mxu0 %v1037_v51 }
 0x384   : > { %2306 = vmatmul.mubr.f32.gmra.mrb[34].mxu0 %v1038_v53  ;;  %v1040_v59 = vmax.f32 %v982_v54, 0.0 }
 0x385   : > { %v1039_v57 = vmax.f32 %v977_v56, 0.0  ;;  %v2257_v58 = vpop.f32.mrb[22].mxu1  ;;  %2521 = vmatpush3.bf16.msra.mxu0 %v2518_v23 }
 0x386   : > { %v992_v60 = vadd.f32 %v2257_v58, %v3179_v40  ;;  %v986_v61 = vpop.f32.mrb[23].mxu1  ;;  %2523 = vmatprep.subr.bf16.mxu0 %v2522_v26 }
 0x387   : > { %v987_v62 = vadd.f32 %v986_v61, %v3179_v40  ;;  %2308 = vmatprep.mubr.f32.mxu0 %v1039_v57 }
 0x388   : > { %2309 = vmatmul.mubr.f32.gmra.mrb[36].mxu0 %v1040_v59  ;;  %v1042_v2 = vmax.f32 %v992_v60, 0.0 }
 0x389   : > { %v1041_v63 = vmax.f32 %v987_v62, 0.0  ;;  %v2260_v0 = vpop.f32.mrb[24].mxu1  ;;  %2525 = vmatpush3.bf16.msra.mxu0 %v2522_v26 }
 0x38a   : > { %v1002_v4 = vadd.f32 %v2260_v0, %v3179_v40  ;;  %v996_v5 = vpop.f32.mrb[25].mxu1  ;;  %2527 = vmatprep.subr.bf16.mxu0 %v3143_v29 }
 0x38b   : > { %v997_v6 = vadd.f32 %v996_v5, %v3179_v40  ;;  %2311 = vmatprep.mubr.f32.mxu0 %v1041_v63 }
 0x38c   : > { %2312 = vmatmul.mubr.f32.gmra.mrb[38].mxu0 %v1042_v2  ;;  %v1044_v9 = vmax.f32 %v1002_v4, 0.0 }
 0x38d   : > { %v1043_v7 = vmax.f32 %v997_v6, 0.0  ;;  %v2263_v8 = vpop.f32.mrb[26].mxu1  ;;  %2529 = vmatpush3.bf16.msra.mxu0 %v3143_v29  ;;  %v2542_v29 = vpack.c.bf16 %v1248_v28, %v1247_v27 }
 0x38e   : > { %v1012_v10 = vadd.f32 %v2263_v8, %v3179_v40  ;;  %v1006_v11 = vpop.f32.mrb[27].mxu1  ;;  %2531 = vmatprep.subr.bf16.mxu0 %v3152_v32 }
 0x38f   : > { %v1007_v12 = vadd.f32 %v1006_v11, %v3179_v40  ;;  %2314 = vmatprep.mubr.f32.mxu0 %v1043_v7  ;;  %2553 = vmatprep.subr.bf16.mxu1 %v2542_v29 }
 0x390   : > { %2315 = vmatmul.mubr.f32.gmra.mrb[40].mxu0 %v1044_v9  ;;  %v1046_v15 = vmax.f32 %v1012_v10, 0.0  ;;  %2561 = vmatpush3.bf16.msra.mxu1 %v2542_v29 }
 0x391   : > { %v1045_v13 = vmax.f32 %v1007_v12, 0.0  ;;  %v2266_v14 = vpop.f32.mrb[28].mxu1  ;;  %2533 = vmatpush3.bf16.msra.mxu0 %v3152_v32 }
 0x392   : > { %v1022_v16 = vadd.f32 %v2266_v14, %v3179_v40  ;;  %v1016_v17 = vpop.f32.mrb[29].mxu1  ;;  %2535 = vmatprep.subr.bf16.mxu0 %v3162_v35 }
 0x393   : > { %v1017_v18 = vadd.f32 %v1016_v17, %v3179_v40  ;;  %2317 = vmatprep.mubr.f32.mxu0 %v1045_v13 }
 0x394   : > { %2318 = vmatmul.mubr.f32.gmra.mrb[42].mxu0 %v1046_v15  ;;  %v1048_v21 = vmax.f32 %v1022_v16, 0.0  ;;  %v3216_v16 = vld [vmem:[%s3374_s5] ss:$0 sm:$0xff] }
 0x395   : > { %v1047_v19 = vmax.f32 %v1017_v18, 0.0  ;;  %v2269_v20 = vpop.f32.mrb[30].mxu1  ;;  %2537 = vmatpush3.bf16.msra.mxu0 %v3162_v35 }
 0x396   : > { %v1032_v22 = vadd.f32 %v2269_v20, %v3179_v40  ;;  %v1026_v23 = vpop.f32.mrb[31].mxu1  ;;  %2539 = vmatprep.subr.bf16.mxu0 %v3172_v38 }
 0x397   : > { %v1027_v24 = vadd.f32 %v1026_v23, %v3179_v40  ;;  %2320 = vmatprep.mubr.f32.mxu0 %v1047_v19 }
 0x398   : > { %2321 = vmatmul.mubr.f32.gmra.mrb[44].mxu0 %v1048_v21  ;;  %v1050_v26 = vmax.f32 %v1032_v22, 0.0 }
 0x399   : > { %v1049_v25 = vmax.f32 %v1027_v24, 0.0  ;;  %2541 = vmatpush3.bf16.msra.mxu0 %v3172_v38 }
 0x39a   : > { %2543 = vmatprep.subr.bf16.mxu0 %v2542_v29 }
 0x39b   : > { %2323 = vmatprep.mubr.f32.mxu0 %v1049_v25 }
 0x39c   : > { %2324 = vmatmul.mubr.f32.gmra.mrb[46].mxu0 %v1050_v26 }
 0x39d   : > { %2545 = vmatpush3.bf16.msra.mxu0 %v2542_v29 }
 0x453   : > { %v2304_v32 = vpop.f32.mrb[32].mxu0 }
 0x454   : > { %v1144_v33 = vadd.f32 %v2304_v32, %v1071_v31  ;;  %v1138_v34 = vpop.f32.mrb[33].mxu0 }
 0x455   : > { %v1139_v35 = vadd.f32 %v1138_v34, %v1071_v31 }
 0x456   : > { %v1218_v38 = vmax.f32 %v1144_v33, 0.0 }
 0x457   : > { %v1217_v36 = vmax.f32 %v1139_v35, 0.0  ;;  %v2307_v37 = vpop.f32.mrb[34].mxu0 }
 0x458   : > { %v1154_v39 = vadd.f32 %v2307_v37, %v1071_v31  ;;  %v1148_v40 = vpop.f32.mrb[35].mxu0 }
 0x459   : > { %v1149_v41 = vadd.f32 %v1148_v40, %v1071_v31  ;;  %2358 = vmatprep.mubr.f32.mxu0 %v1217_v36 }
 0x45a   : > { %2359 = vmatmul.mubr.f32.vlgmr.msra.gmra.mrb[48].mxu0 %v1218_v38  ;;  %v1220_v44 = vmax.f32 %v1154_v39, 0.0 }
 0x45b   : > { %v1219_v42 = vmax.f32 %v1149_v41, 0.0  ;;  %v2310_v43 = vpop.f32.mrb[36].mxu0 }
 0x45c   : > { %v1164_v45 = vadd.f32 %v2310_v43, %v1071_v31  ;;  %v1158_v46 = vpop.f32.mrb[37].mxu0 }
 0x45d   : > { %v1159_v1 = vadd.f32 %v1158_v46, %v1071_v31  ;;  %2361 = vmatprep.mubr.f32.mxu0 %v1219_v42 }
 0x45e   : > { %2362 = vmatmul.mubr.f32.gmra.mrb[50].mxu0 %v1220_v44  ;;  %v1222_v48 = vmax.f32 %v1164_v45, 0.0 }
 0x45f   : > { %v1221_v3 = vmax.f32 %v1159_v1, 0.0  ;;  %v2313_v47 = vpop.f32.mrb[38].mxu0 }
 0x460   : > { %v1174_v49 = vadd.f32 %v2313_v47, %v1071_v31  ;;  %v1168_v50 = vpop.f32.mrb[39].mxu0 }
 0x461   : > { %v1169_v51 = vadd.f32 %v1168_v50, %v1071_v31  ;;  %2364 = vmatprep.mubr.f32.mxu0 %v1221_v3 }
 0x462   : > { %2365 = vmatmul.mubr.f32.gmra.mrb[52].mxu0 %v1222_v48  ;;  %v1224_v54 = vmax.f32 %v1174_v49, 0.0 }
 0x463   : > { %v1223_v52 = vmax.f32 %v1169_v51, 0.0  ;;  %v2316_v53 = vpop.f32.mrb[40].mxu0 }
 0x464   : > { %v1184_v55 = vadd.f32 %v2316_v53, %v1071_v31  ;;  %v1178_v56 = vpop.f32.mrb[41].mxu0 }
 0x465   : > { %v1179_v57 = vadd.f32 %v1178_v56, %v1071_v31  ;;  %2367 = vmatprep.mubr.f32.mxu1 %v1223_v52 }
 0x466   : > { %2368 = vmatmul.mubr.f32.vlgmr.msra.gmra.mrb[32].mxu1 %v1224_v54  ;;  %v1226_v60 = vmax.f32 %v1184_v55, 0.0 }
 0x467   : > { %v1225_v58 = vmax.f32 %v1179_v57, 0.0  ;;  %v2319_v59 = vpop.f32.mrb[42].mxu0 }
 0x468   : > { %v1194_v61 = vadd.f32 %v2319_v59, %v1071_v31  ;;  %v1188_v62 = vpop.f32.mrb[43].mxu0 }
 0x469   : > { %v1189_v63 = vadd.f32 %v1188_v62, %v1071_v31  ;;  %2370 = vmatprep.mubr.f32.mxu1 %v1225_v58 }
 0x46a   : > { %2371 = vmatmul.mubr.f32.gmra.mrb[34].mxu1 %v1226_v60  ;;  %v1228_v4 = vmax.f32 %v1194_v61, 0.0 }
 0x46b   : > { %v1227_v0 = vmax.f32 %v1189_v63, 0.0  ;;  %v2322_v2 = vpop.f32.mrb[44].mxu0 }
 0x46c   : > { %v1204_v5 = vadd.f32 %v2322_v2, %v1071_v31  ;;  %v1198_v6 = vpop.f32.mrb[45].mxu0 }
 0x46d   : > { %v1199_v7 = vadd.f32 %v1198_v6, %v1071_v31  ;;  %2373 = vmatprep.mubr.f32.mxu1 %v1227_v0 }
 0x46e   : > { %2374 = vmatmul.mubr.f32.gmra.mrb[36].mxu1 %v1228_v4  ;;  %v1230_v10 = vmax.f32 %v1204_v5, 0.0 }
 0x46f   : > { %v1229_v8 = vmax.f32 %v1199_v7, 0.0  ;;  %v2325_v9 = vpop.f32.mrb[46].mxu0 }
 0x470   : > { %v1214_v11 = vadd.f32 %v2325_v9, %v1071_v31  ;;  %v1208_v12 = vpop.f32.mrb[47].mxu0 }
 0x471   : > { %v1209_v13 = vadd.f32 %v1208_v12, %v1071_v31  ;;  %2376 = vmatprep.mubr.f32.mxu1 %v1229_v8 }
 0x472   : > { %2377 = vmatmul.mubr.f32.gmra.mrb[38].mxu1 %v1230_v10  ;;  %v1232_v15 = vmax.f32 %v1214_v11, 0.0 }
 0x473   : > { %v1231_v14 = vmax.f32 %v1209_v13, 0.0 }
 0x475   : > { %2379 = vmatprep.mubr.f32.mxu1 %v1231_v14 }
 0x476   : > { %2380 = vmatmul.mubr.f32.gmra.mrb[40].mxu1 %v1232_v15 }
 0x52d   : > { %v2360_v17 = vpop.f32.mrb[48].mxu0 }
 0x52e   : > { %v1328_v18 = vadd.f32 %v2360_v17, %v3216_v16  ;;  %v1322_v19 = vpop.f32.mrb[49].mxu0 }
 0x52f   : > { %v1323_v20 = vadd.f32 %v3216_v16, %v1322_v19 }
 0x530   : > { %v1861_v21 = vmul.f32 -1.442695, %v1328_v18 }
 0x531   : > { %v1860_v22 = vmul.f32 -1.442695, %v1323_v20  ;;  %v2363_v23 = vpop.f32.mrb[50].mxu0 }
 0x532   : > { %2650 = vpow2.f32 %v1861_v21  ;;  %v1338_v24 = vadd.f32 %v2363_v23, %v3216_v16  ;;  %v1332_v25 = vpop.f32.mrb[51].mxu0 }
 0x533   : > { %2652 = vpow2.f32 %v1860_v22  ;;  %v1333_v26 = vadd.f32 %v3216_v16, %v1332_v25 }
 0x534   : > { %v1863_v27 = vmul.f32 -1.442695, %v1338_v24 }
 0x535   : > { %v1862_v28 = vmul.f32 -1.442695, %v1333_v26  ;;  %v2366_v29 = vpop.f32.mrb[52].mxu0 }
 0x536   : > { %2654 = vpow2.f32 %v1863_v27  ;;  %v1348_v30 = vadd.f32 %v2366_v29, %v3216_v16  ;;  %v1342_v31 = vpop.f32.mrb[53].mxu0 }
 0x537   : > { %2656 = vpow2.f32 %v1862_v28  ;;  %v1343_v32 = vadd.f32 %v3216_v16, %v1342_v31 }
 0x538   : > { %v1865_v33 = vmul.f32 -1.442695, %v1348_v30 }
 0x539   : > { %v1864_v34 = vmul.f32 -1.442695, %v1343_v32  ;;  %v2369_v35 = vpop.f32.mrb[32].mxu1 }
 0x53a   : > { %2658 = vpow2.f32 %v1865_v33  ;;  %v1358_v36 = vadd.f32 %v2369_v35, %v3216_v16  ;;  %v1352_v37 = vpop.f32.mrb[33].mxu1 }
 0x53b   : > { %2660 = vpow2.f32 %v1864_v34  ;;  %v1353_v38 = vadd.f32 %v3216_v16, %v1352_v37 }
 0x53c   : > { %v2651_v39 = vpop.eup %2650  ;;  %v1867_v40 = vmul.f32 -1.442695, %v1358_v36 }
 0x53d   : > { %v2653_v41 = vpop.eup %2652  ;;  %v1450_v42 = vadd.f32 1.0, %v2651_v39  ;;  %v1866_v43 = vmul.f32 -1.442695, %v1353_v38  ;;  %v2372_v44 = vpop.f32.mrb[34].mxu1 }
 0x53e   : > { %v1449_v45 = vadd.f32 1.0, %v2653_v41  ;;  %2662 = vpow2.f32 %v1867_v40  ;;  %v1368_v46 = vadd.f32 %v2372_v44, %v3216_v16  ;;  %v1362_v1 = vpop.f32.mrb[35].mxu1 }
 0x53f   : > { %2664 = vrcp.f32 %v1450_v42  ;;  %v1363_v3 = vadd.f32 %v3216_v16, %v1362_v1 }
 0x540   : > { %v2655_v47 = vpop.eup %2654  ;;  %2666 = vrcp.f32 %v1449_v45  ;;  %v1869_v48 = vmul.f32 -1.442695, %v1368_v46 }
 0x541   : > { %v2657_v49 = vpop.eup %2656  ;;  %v1452_v50 = vadd.f32 1.0, %v2655_v47  ;;  %2668 = vpow2.f32 %v1866_v43  ;;  %v1868_v51 = vmul.f32 -1.442695, %v1363_v3  ;;  %v2375_v52 = vpop.f32.mrb[36].mxu1 }
 0x542   : > { %v1451_v53 = vadd.f32 1.0, %v2657_v49  ;;  %2670 = vpow2.f32 %v1869_v48  ;;  %v1378_v54 = vadd.f32 %v2375_v52, %v3216_v16  ;;  %v1372_v55 = vpop.f32.mrb[37].mxu1 }
 0x543   : > { %2672 = vrcp.f32 %v1452_v50  ;;  %v1373_v56 = vadd.f32 %v3216_v16, %v1372_v55 }
 0x544   : > { %v2659_v57 = vpop.eup %2658  ;;  %2674 = vrcp.f32 %v1451_v53  ;;  %v1871_v58 = vmul.f32 -1.442695, %v1378_v54 }
 0x545   : > { %v2661_v59 = vpop.eup %2660  ;;  %v1454_v60 = vadd.f32 1.0, %v2659_v57  ;;  %2676 = vpow2.f32 %v1868_v51  ;;  %v1870_v61 = vmul.f32 -1.442695, %v1373_v56  ;;  %v2378_v62 = vpop.f32.mrb[38].mxu1 }
 0x546   : > { %v1453_v63 = vadd.f32 1.0, %v2661_v59  ;;  %2678 = vpow2.f32 %v1871_v58  ;;  %v1388_v0 = vadd.f32 %v2378_v62, %v3216_v16  ;;  %v1382_v2 = vpop.f32.mrb[39].mxu1 }
 0x547   : > { %2680 = vrcp.f32 %v1454_v60  ;;  %v1383_v4 = vadd.f32 %v3216_v16, %v1382_v2 }
 0x548   : > { %v2663_v5 = vpop.eup %2662  ;;  %2682 = vrcp.f32 %v1453_v63  ;;  %v1873_v6 = vmul.f32 -1.442695, %v1388_v0 }
 0x549   : > { %v2665_v7 = vpop.eup %2664  ;;  %v1456_v8 = vadd.f32 1.0, %v2663_v5  ;;  %2684 = vpow2.f32 %v1870_v61  ;;  %v1872_v9 = vmul.f32 -1.442695, %v1383_v4  ;;  %v2381_v10 = vpop.f32.mrb[40].mxu1 }
 0x54a   : > { %v2667_v11 = vpop.eup %2666  ;;  %1498 = vst.msk [vmem:[%s3233_s21 + $0x8] sm:$0xff] %vm296_vm0, %v2665_v7  ;;  %2686 = vpow2.f32 %v1873_v6  ;;  %v1398_v12 = vadd.f32 %v2381_v10, %v3216_v16  ;;  %v1392_v13 = vpop.f32.mrb[41].mxu1 }
 0x54b   : > { %v2669_v14 = vpop.eup %2668  ;;  %1497 = vst.msk [vmem:[%s3233_s21] sm:$0xff] %vm296_vm0, %v2667_v11  ;;  %2688 = vrcp.f32 %v1456_v8  ;;  %v1393_v15 = vadd.f32 %v3216_v16, %v1392_v13 }
 0x54c   : > { %v2671_v17 = vpop.eup %2670  ;;  %v1455_v18 = vadd.f32 1.0, %v2669_v14  ;;  %2690 = vpow2.f32 %v1872_v9  ;;  %v1875_v19 = vmul.f32 -1.442695, %v1398_v12 }
 0x54d   : > { %v2673_v20 = vpop.eup %2672  ;;  %v1458_v21 = vadd.f32 1.0, %v2671_v17  ;;  %v1874_v22 = vmul.f32 -1.442695, %v1393_v15 }
 0x54e   : > { %v2675_v23 = vpop.eup %2674  ;;  %1500 = vst.msk [vmem:[%s3233_s21 + $0x18] sm:$0xff] %vm296_vm0, %v2673_v20  ;;  %2692 = vrcp.f32 %v1455_v18 }
 0x54f   : > { %v2677_v24 = vpop.eup %2676  ;;  %1499 = vst.msk [vmem:[%s3233_s21 + $0x10] sm:$0xff] %vm296_vm0, %v2675_v23  ;;  %2694 = vrcp.f32 %v1458_v21 }
 0x550   : > { %v2679_v25 = vpop.eup %2678  ;;  %v1457_v26 = vadd.f32 1.0, %v2677_v24  ;;  %2696 = vpow2.f32 %v1875_v19 }
 0x551   : > { %v2681_v16 = vpop.eup %2680  ;;  %v1460_v27 = vadd.f32 1.0, %v2679_v25  ;;  %2698 = vpow2.f32 %v1874_v22 }
 0x552   : > { %v2683_v28 = vpop.eup %2682  ;;  %1502 = vst.msk [vmem:[%s3233_s21 + $0x28] sm:$0xff] %vm296_vm0, %v2681_v16  ;;  %2700 = vrcp.f32 %v1457_v26 }
 0x553   : > { %v2685_v29 = vpop.eup %2684  ;;  %1501 = vst.msk [vmem:[%s3233_s21 + $0x20] sm:$0xff] %vm296_vm0, %v2683_v28  ;;  %2702 = vrcp.f32 %v1460_v27 }
 0x554   : > { %v2687_v30 = vpop.eup %2686  ;;  %v1459_v31 = vadd.f32 1.0, %v2685_v29 }
 0x555   : > { %v2689_v32 = vpop.eup %2688  ;;  %v1462_v33 = vadd.f32 1.0, %v2687_v30 }
 0x556   : > { %v2691_v34 = vpop.eup %2690  ;;  %1504 = vst.msk [vmem:[%s3233_s21 + $0x38] sm:$0xff] %vm296_vm0, %v2689_v32  ;;  %2704 = vrcp.f32 %v1459_v31 }
 0x557   : > { %2706 = vrcp.f32 %v1462_v33  ;;  %v1461_v35 = vadd.f32 1.0, %v2691_v34 }
 0x558   : > { %v2693_v36 = vpop.eup %2692 }
 0x559   : > { %v2695_v37 = vpop.eup %2694  ;;  %1503 = vst.msk [vmem:[%s3233_s21 + $0x30] sm:$0xff] %vm296_vm0, %v2693_v36  ;;  %2708 = vrcp.f32 %v1461_v35 }
 0x55a   : > { %v2697_v38 = vpop.eup %2696  ;;  %1506 = vst.msk [vmem:[%s3233_s21 + $0x48] sm:$0xff] %vm296_vm0, %v2695_v37 }
 0x55b   : > { %v2699_v39 = vpop.eup %2698  ;;  %v1464_v40 = vadd.f32 1.0, %v2697_v38 }
 0x55c   : > { %v2701_v41 = vpop.eup %2700  ;;  %v1463_v42 = vadd.f32 1.0, %v2699_v39 }
 0x55d   : > { %v2703_v43 = vpop.eup %2702  ;;  %1505 = vst.msk [vmem:[%s3233_s21 + $0x40] sm:$0xff] %vm296_vm0, %v2701_v41  ;;  %2710 = vrcp.f32 %v1464_v40 }
 0x55e   : > { %1508 = vst.msk [vmem:[%s3233_s21 + $0x58] sm:$0xff] %vm296_vm0, %v2703_v43  ;;  %2712 = vrcp.f32 %v1463_v42 }
 0x560   : > { %v2705_v44 = vpop.eup %2704 }
 0x561   : > { %v2707_v45 = vpop.eup %2706  ;;  %1507 = vst.msk [vmem:[%s3233_s21 + $0x50] sm:$0xff] %vm296_vm0, %v2705_v44 }
 0x562   : > { %1510 = vst.msk [vmem:[%s3233_s21 + $0x68] sm:$0xff] %vm296_vm0, %v2707_v45 }
 0x563   : > { %v2709_v46 = vpop.eup %2708  ;;  %1519 = sbr.rel (!%p2862_p4) target bundleno = 1435 (0x59b), region = 48 }
 0x564   : > { %1509 = vst.msk [vmem:[%s3233_s21 + $0x60] sm:$0xff] %vm296_vm0, %v2709_v46 }
 0x567   : > { %v2711_v1 = vpop.eup %2710 }
 0x568   : > { %v2713_v3 = vpop.eup %2712  ;;  %1512 = vst.msk [vmem:[%s3233_s21 + $0x78] sm:$0xff] %vm296_vm0, %v2711_v1 }
 0x569   : > { %1511 = vst.msk [vmem:[%s3233_s21 + $0x70] sm:$0xff] %vm296_vm0, %v2713_v3 }
 0x56a   : > { %s3384_s13 = smov (!%p1522_p8, %s1521_s13), 16 }
 0x56b   : > { %s1878_s18 = sshll.u32 %s3384_s13, 7 }
 0x56c   : > { %p1881_p9 = scmp.eq.s32.totalorder %s1878_s18, 0 }
 0x56d   : > { %s3282_s9 = sshrl.u32 (!%p1881_p9), %s3384_s13, 4 }
 0x56e   : > { %1530 = sbr.rel (%p1881_p9) target bundleno = 1435 (0x59b), region = 52  ;;  %p1882_p10 = scmp.le.s32.totalorder (!%p1881_p9), %s3282_s9, 0 }
 0x575   : > { %1744 = sbr.rel (%p1882_p10) target bundleno = 1414 (0x586), region = 131  ;;  %s3377_s24 = smov (!%p1882_p10), %s3276_s17 }
 0x576   : > { %s3378_s29 = smov (!%p1882_p10), %s3233_s21  ;;  %s3291_s10 = smov (!%p1882_p10), 0  }
 0x577   : > { %s3293_s19 = smov (!%p1882_p10), 0  }
 0x57c LB: >> { %v1622_v47 = vld [vmem:[%s2776_s29] sm:$0xff]  ;;  %v1624_v48 = vld [vmem:[%s2776_s29 + $0x8] sm:$0xff]  ;;  %v1626_v49 = vld [vmem:[%s2776_s29 + $0x10] sm:$0xff]  ;;  %s1654_s20 = sadd.s32 1, %s2780_s10  ;;  %s1616_s19 = sadd.s32 1, %s2784_s19   ;;  %s2784_s19 = sphi %s3293_s19, %s1616_s19   ;;  %s2780_s10 = sphi %s3291_s10, %s3379_s10   ;;  %s2776_s29 = sphi %s3378_s29, %s1659_s29   ;;  %s2772_s24 = sphi %s3377_s24, %s1660_s24  }
 0x57d   : >> { %1623 = vst [vmem:[%s2772_s24] sm:$0xff] %v1622_v47  ;;  %1625 = vst [vmem:[%s2772_s24 + $0x8] sm:$0xff] %v1624_v48  ;;  %v1628_v50 = vld [vmem:[%s2776_s29 + $0x18] sm:$0xff]  ;;  %v1630_v51 = vld [vmem:[%s2776_s29 + $0x20] sm:$0xff]  ;;  %p1655_p11 = scmp.ge.s32.totalorder %s1654_s20, %s3282_s9  ;;  %p1615_p12 = scmp.ge.s32.totalorder %s1616_s19, %s3282_s9 }
 0x57e   : >> { %1627 = vst [vmem:[%s2772_s24 + $0x10] sm:$0xff] %v1626_v49  ;;  %v1632_v52 = vld [vmem:[%s2776_s29 + $0x28] sm:$0xff]  ;;  %1629 = vst [vmem:[%s2772_s24 + $0x18] sm:$0xff] %v1628_v50  ;;  %v1634_v53 = vld [vmem:[%s2776_s29 + $0x30] sm:$0xff] }
 0x57f   : >> { %1631 = vst [vmem:[%s2772_s24 + $0x20] sm:$0xff] %v1630_v51  ;;  %1633 = vst [vmem:[%s2772_s24 + $0x28] sm:$0xff] %v1632_v52  ;;  %v1636_v54 = vld [vmem:[%s2776_s29 + $0x38] sm:$0xff]  ;;  %v1638_v55 = vld [vmem:[%s2776_s29 + $0x40] sm:$0xff]  ;;  %s3386_s20 = smov (%p1655_p11, %s1654_s20), 0  ;;  %1618 = sbr.rel (!%p1615_p12) target bundleno = 1404 (0x57c), region = 137 }
 0x580   : >> { %1635 = vst [vmem:[%s2772_s24 + $0x30] sm:$0xff] %v1634_v53  ;;  %1637 = vst [vmem:[%s2772_s24 + $0x38] sm:$0xff] %v1636_v54  ;;  %v1640_v56 = vld [vmem:[%s2776_s29 + $0x48] sm:$0xff]  ;;  %v1642_v57 = vld [vmem:[%s2776_s29 + $0x50] sm:$0xff]  ;;  %s1883_s23 = sshll.u32 %s3386_s20, 7  ;;  %s3379_s10 = smov %s3386_s20 }
 0x581   : >> { %1639 = vst [vmem:[%s2772_s24 + $0x40] sm:$0xff] %v1638_v55  ;;  %v1644_v58 = vld [vmem:[%s2776_s29 + $0x58] sm:$0xff]  ;;  %1641 = vst [vmem:[%s2772_s24 + $0x48] sm:$0xff] %v1640_v56  ;;  %v1646_v59 = vld [vmem:[%s2776_s29 + $0x60] sm:$0xff] }
 0x582   : >> { %1643 = vst [vmem:[%s2772_s24 + $0x50] sm:$0xff] %v1642_v57  ;;  %1645 = vst [vmem:[%s2772_s24 + $0x58] sm:$0xff] %v1644_v58  ;;  %v1648_v60 = vld [vmem:[%s2776_s29 + $0x68] sm:$0xff]  ;;  %v1650_v61 = vld [vmem:[%s2776_s29 + $0x70] sm:$0xff] }
 0x583   : >> { %1647 = vst [vmem:[%s2772_s24 + $0x60] sm:$0xff] %v1646_v59  ;;  %1649 = vst [vmem:[%s2772_s24 + $0x68] sm:$0xff] %v1648_v60  ;;  %v1652_v62 = vld [vmem:[%s2776_s29 + $0x78] sm:$0xff]  ;;  %s1659_s29 = scalar_lea.vmem %s3233_s21, %s1883_s23 [#allocation2]  }
 0x584   : >> { %1651 = vst [vmem:[%s2772_s24 + $0x70] sm:$0xff] %v1650_v61  ;;  %1653 = vst [vmem:[%s2772_s24 + $0x78] sm:$0xff] %v1652_v62  ;;  %s1660_s24 = scalar_lea.vmem %s3276_s17, %s1883_s23  }
 0x586 PF: > { %s3351_s26 = sand.u32 15, %s3384_s13   ;;  %s1894_s27 = sshll.u32 %s3282_s9, 7 }
 0x587   : > { %s1665_s30 = scalar_lea.vmem %s3233_s21, %s1894_s27 [#allocation2]   ;;  %s1667_s7 = scalar_lea.vmem %s3276_s17, %s1894_s27  }
 0x588   : > { %p1888_p13 = scmp.le.s32.totalorder %s3351_s26, 0 }
 0x589   : > { %s2786_s8 = smov (!%p1888_p13), %s1667_s7   ;;  %s2790_s11 = smov (!%p1888_p13), %s1665_s30  }
 0x58a   : > { %1758 = sbr.rel (%p1888_p13) target bundleno = 1435 (0x59b), region = 142  ;;  %s2794_s12 = smov (!%p1888_p13), 0  }
 0x58b   : > { %s2798_s14 = smov (!%p1888_p13), 0  }
 0x591 LB: >> { %v1677_v63 = vld [vmem:[%s2792_s11] sm:$0xff]  ;;  %s1679_s13 = sadd.s32 1, %s2796_s12  ;;  %s1671_s14 = sadd.s32 1, %s2800_s14   ;;  %s2800_s14 = sphi %s2798_s14, %s1671_s14   ;;  %s2796_s12 = sphi %s2794_s12, %s2795_s12   ;;  %s2792_s11 = sphi %s2790_s11, %s1684_s11   ;;  %s2788_s8 = sphi %s2786_s8, %s1685_s8  }
 0x592   : >> { %1678 = vst [vmem:[%s2788_s8] sm:$0xff] %v1677_v63  ;;  %p1680_p0 = scmp.ge.s32.totalorder %s1679_s13, %s3351_s26  ;;  %p1670_p1 = scmp.ge.s32.totalorder %s1671_s14, %s3351_s26 }
 0x594   : >> { %s3388_s13 = smov (%p1680_p0, %s1679_s13), 0  ;;  %1673 = sbr.rel (!%p1670_p1) target bundleno = 1425 (0x591), region = 148 }
 0x595   : >> { %s1889_s21 = sshll.u32 %s3388_s13, 3  ;;  %s2795_s12 = smov %s3388_s13  }
 0x596   : >> { %s1684_s11 = scalar_lea.vmem %s1665_s30, %s1889_s21 [#allocation2]   ;;  %s1685_s8 = scalar_lea.vmem %s1667_s7, %s1889_s21  }
 0x59b PF: > { %p13_p2 = scmp.ge.s32.totalorder %s2852_s25, 4   ;;  %s3380_s21 = smov %s2764_s22 }
 0x59c   : > { %s3381_s22 = smov %s2860_s28  ;;  %s3382_s23 = smov %s2852_s25 }
 0x59d   :  { %15 = sbr.rel (!%p13_p2) target bundleno = 2 (0x2), region = 159 }

</bundles_post_ra>
